<compile_context>
chip_gen: v5e
topology: v5e:2x2
jax: 0.10.0
libtpu: 0.0.40
codegen_flags: <defaults>
</compile_context>

<pallas_src>
import functools

import jax
import jax.numpy as jnp
from jax import lax
from jax.experimental import pallas as pl
from jax.experimental.pallas import tpu as pltpu

# ----------------------------- static config --------------------------------
FDIM = 64            # cfg.head_nfeat (multiple of 16)
NCONV = 2            # cfg.head_nconv  (>= 2 assumed below)
ROIP = 8             # cfg.roip_size
GROUPS = 16          # nn.GroupNorm(16, fdim)
HEAD_OPROI = True    # cfg.head_oproi
EPS = 1e-5           # nn.GroupNorm default
HW = ROIP * ROIP
CG = FDIM // GROUPS
C2 = 2 * FDIM                      # fused (tower1 | tower2) channel width
INV_COUNT = 1.0 / float(HW * CG)   # GroupNorm 1/(H*W*channels_per_group)
NOUT = 7                           # 2 cls + 1 olp + 4 reg
NSLAB = 5                          # head slabs: [cls0|olp][cls1|reg0][.|reg1][.|reg2][.|reg3]
OUT_LANES = 128                    # lane-dense output block width
BLOCK_B = 64                       # samples per grid step (swept 32-64)


# ------------------------------- Pallas kernel ------------------------------
def det_head_kernel(x_ref, ident_ref, wl1_ref, wlr_ref, vec_ref, mavg_ref,
                    whead_ref, rsel_ref, bhead_ref, out_ref):
    B = x_ref.shape[0]
    mavg = mavg_ref[...]                      # (2C, 2C) group-avg matrix (f32)

    def gn_relu(y2d, layer):
        # Single-stats-pass fused-tower GroupNorm + ReLU (bias folded into stats).
        bias = vec_ref[3 * layer + 0]         # (1, 2C)
        gamma = vec_ref[3 * layer + 1]        # (1, 2C)
        beta = vec_ref[3 * layer + 2]         # (1, 2C)
        y3 = y2d.reshape(B, HW, C2)           # leading-dim split (layout-trivial)
        ch_sum = jnp.sum(y3, axis=1)                                    # (B, 2C)
        ch_sumsq = jnp.sum(y3 * y3, axis=1)                             # (B, 2C)
        sum_z = ch_sum + float(HW) * bias
        sumsq_z = ch_sumsq + 2.0 * bias * ch_sum + float(HW) * (bias * bias)
        mean = jnp.dot(sum_z, mavg, preferred_element_type=jnp.float32)   # (B, 2C)
        ex2 = jnp.dot(sumsq_z, mavg, preferred_element_type=jnp.float32)  # (B, 2C)
        var = jnp.maximum(ex2 - mean * mean, 0.0)
        scale = lax.rsqrt(var + EPS) * gamma                            # (B, 2C)
        shift = (bias - mean) * scale + beta                            # (B, 2C)
        return jnp.maximum(y3 * scale[:, None, :] + shift[:, None, :], 0.0)

    # NCHW -> NHWC inside the kernel: batched identity matmul on the HW axis
    # (MXU-native 'contract both minors' form; avoids a separate XLA transpose
    #  pass over the whole input in HBM).
    x_b = x_ref[...].astype(jnp.bfloat16)                       # (B, C, HW)
    ident = jnp.broadcast_to(ident_ref[...], (B, HW, HW))       # bf16 identity
    x_nhwc = jnp.einsum('bhk,bck->bhc', ident, x_b,
                        preferred_element_type=jnp.float32)     # (B, HW, C)

    # Layer 0: (B*HW, C) @ (C, 2C) -> both towers in one lane-dense matmul.
    y = jnp.dot(x_nhwc.reshape(B * HW, FDIM).astype(jnp.bfloat16), wl1_ref[...],
                preferred_element_type=jnp.float32)
    h = gn_relu(y, 0)

    # Layers 1..NCONV-1: block-diagonal (2C, 2C) keeps the towers fused.
    for l in range(1, NCONV):
        y = jnp.dot(h.reshape(B * HW, C2).astype(jnp.bfloat16), wlr_ref[l - 1],
                    preferred_element_type=jnp.float32)
        h = gn_relu(y, l)

    # Heads: bf16 spatial weighting over 5 packed 128-lane slabs, HW reduction
    # accumulated in f32, then ONE (B, 5*2C) @ (5*2C, 128) MXU matmul collapses
    # the channel sums into a lane-dense (B, 128) output block.
    h_b = h.astype(jnp.bfloat16)                                # (B, HW, 2C)
    sums = [jnp.sum(h_b * whead_ref[j], axis=1, dtype=jnp.float32)
            for j in range(NSLAB)]                              # (B, 2C) each
    s_cat = jnp.concatenate(sums, axis=1)                       # (B, NSLAB*2C)
    out = jnp.dot(s_cat, rsel_ref[...], preferred_element_type=jnp.float32)
    out_ref[...] = out + bhead_ref[...]                         # (B, 128) dense


# ------------------------------ wrapper (glue) -------------------------------
def _const_spec(shape):
    nd = len(shape)
    return pl.BlockSpec(shape, lambda n, _nd=nd: (0,) * _nd)


def det_head_forward(x_nchw, p, block_b=BLOCK_B):
    """x_nchw: (N, FDIM, ROIP, ROIP) float32. Returns (cl, op, re) like torch."""
    assert NCONV >= 2
    assert block_b % 8 == 0
    N, C, H, W = x_nchw.shape
    assert C == FDIM and H == ROIP and W == ROIP
    f32 = jnp.float32

    # Keep NCHW in HBM; only a free trailing-dim merge here.  The transpose
    # happens in-kernel and the batch tail is handled by the cdiv grid.
    x_flat = x_nchw.reshape(N, C, HW)

    # Batch-block: keep >= 2 grid steps when possible so the 'parallel' axis
    # can shard across v7x's two TensorCores; B is a multiple of 8 (or == N).
    if N > block_b:
        B = block_b
    elif N >= 16:
        half = -(-N // 2)
        B = -(-half // 8) * 8
    else:
        B = N
    grid_n = pl.cdiv(N, B)

    # Identity used for the in-kernel NCHW->NHWC conversion.
    ident = jnp.eye(HW, dtype=jnp.bfloat16)

    # ---- fused tower weights (bf16 for the MXU) ----
    w1_t = jnp.transpose(p["w1"], (0, 2, 1))    # (NCONV, Cin, Cout)
    w2_t = jnp.transpose(p["w2"], (0, 2, 1))
    wl1 = jnp.concatenate([w1_t[0], w2_t[0]], axis=1).astype(jnp.bfloat16)  # (C, 2C)
    zcc = jnp.zeros((C, C), f32)
    wlr = jnp.stack([
        jnp.concatenate([jnp.concatenate([w1_t[l], zcc], axis=1),
                         jnp.concatenate([zcc, w2_t[l]], axis=1)], axis=0)
        for l in range(1, NCONV)], axis=0).astype(jnp.bfloat16)  # (NCONV-1, 2C, 2C)

    # Per-layer (bias, gamma, beta) packed: (NCONV*3, 1, 2C)
    vec = jnp.stack([
        jnp.concatenate([p["b1"], p["b2"]], axis=1),
        jnp.concatenate([p["g1"], p["g2"]], axis=1),
        jnp.concatenate([p["bt1"], p["bt2"]], axis=1)], axis=1)   # (NCONV, 3, 2C)
    vec = vec.reshape(NCONV * 3, 1, C2).astype(f32)

    # GroupNorm group-averaging matrix over the fused 2C channels
    # (groups of CG contiguous channels; never crosses the tower boundary).
    gid = jnp.arange(C2) // CG
    mavg = (gid[:, None] == gid[None, :]).astype(f32) * INV_COUNT     # (2C, 2C)

    # Head weights packed into 5 slabs of (HW, 2C): tower-1 half carries the
    # 2 cls weights, tower-2 half carries olp + 4 reg weights.
    def head_w(w):  # (o, C, R, R) -> (o, HW, C), matching the NHWC flatten
        return jnp.transpose(w, (0, 2, 3, 1)).reshape(w.shape[0], HW, C)

    t1_heads = head_w(p["wcls"])                                       # (2, HW, C)
    t2_heads = head_w(jnp.concatenate([p["wolp"], p["wreg"]], axis=0)) # (5, HW, C)
    t1_pad = jnp.concatenate([t1_heads, jnp.zeros((NSLAB - 2, HW, C), f32)], axis=0)
    whead = jnp.concatenate([t1_pad, t2_heads], axis=2).astype(jnp.bfloat16)  # (5,HW,2C)

    # Channel-sum collapse matrix (lane-dense, 128 wide).  Output columns:
    # 0,1 = cls, 2 = olp, 3..6 = reg;  -1 marks unused (zero) slab halves.
    # TODO(synk): if HEAD_OPROI=False, repack the slabs/col_map without olp.
    col_map = jnp.array([[0, 2], [1, 3], [-1, 4], [-1, 5], [-1, 6]], jnp.int32)
    col_per_row = jnp.repeat(col_map.reshape(-1), C)                   # (NSLAB*2C,)
    rsel = (col_per_row[:, None] == jnp.arange(OUT_LANES)[None, :]).astype(f32)

    bias_all = jnp.concatenate([p["bcls"], p["bolp"], p["breg"]])      # (7,)
    bhead = jnp.zeros((OUT_LANES,), f32).at[:NOUT].set(bias_all).reshape(1, OUT_LANES)

    out_full = pl.pallas_call(
        det_head_kernel,
        out_shape=jax.ShapeDtypeStruct((N, OUT_LANES), f32),
        grid_spec=pltpu.PrefetchScalarGridSpec(
            num_scalar_prefetch=0,
            grid=(grid_n,),
            in_specs=[
                pl.BlockSpec((B, C, HW), lambda n: (n, 0, 0)),   # x (NCHW block)
                _const_spec((HW, HW)),                           # identity
                _const_spec((C, C2)),                            # wl1
                _const_spec((NCONV - 1, C2, C2)),                # wlr
                _const_spec((NCONV * 3, 1, C2)),                 # vec (bias/gamma/beta)
                _const_spec((C2, C2)),                           # mavg
                _const_spec((NSLAB, HW, C2)),                    # whead (bf16)
                _const_spec((NSLAB * C2, OUT_LANES)),            # rsel (lane-dense)
                _const_spec((1, OUT_LANES)),                     # bhead
            ],
            out_specs=pl.BlockSpec((B, OUT_LANES), lambda n: (n, 0)),
        ),
        compiler_params=pltpu.CompilerParams(
            dimension_semantics=("parallel",),
            vmem_limit_bytes=32 * 1024 * 1024),
    )(x_flat, ident, wl1, wlr, vec, mavg, whead, rsel, bhead)

    out = out_full[:, :NOUT]
    cl = out[:, 0:2].reshape(N, 2, 1, 1)
    op = out[:, 2:3].reshape(N, 1, 1, 1) if HEAD_OPROI else None
    re = out[:, 3:7].reshape(N, 4, 1, 1)
    return cl, op, re


# ------------------------- parameter init (synthetic) ------------------------
def init_params(key):
    # Conv2d weights ~ N(0, 0.001), biases = 0 (module's init loop);
    # GroupNorm default affine init (gamma=1, beta=0).
    keys = jax.random.split(key, 2 * NCONV + 3)
    w1 = jnp.stack([jax.random.normal(keys[i], (FDIM, FDIM), jnp.float32) * 1e-3
                    for i in range(NCONV)])
    w2 = jnp.stack([jax.random.normal(keys[NCONV + i], (FDIM, FDIM), jnp.float32) * 1e-3
                    for i in range(NCONV)])
    wcls = jax.random.normal(keys[2 * NCONV + 0], (2, FDIM, ROIP, ROIP), jnp.float32) * 1e-3
    wolp = jax.random.normal(keys[2 * NCONV + 1], (1, FDIM, ROIP, ROIP), jnp.float32) * 1e-3
    wreg = jax.random.normal(keys[2 * NCONV + 2], (4, FDIM, ROIP, ROIP), jnp.float32) * 1e-3
    zeros_c = jnp.zeros((NCONV, FDIM), jnp.float32)
    ones_c = jnp.ones((NCONV, FDIM), jnp.float32)
    return dict(w1=w1, b1=zeros_c, g1=ones_c, bt1=zeros_c,
                w2=w2, b2=zeros_c, g2=ones_c, bt2=zeros_c,
                wcls=wcls, bcls=jnp.zeros((2,), jnp.float32),
                wolp=wolp, bolp=jnp.zeros((1,), jnp.float32),
                wreg=wreg, breg=jnp.zeros((4,), jnp.float32))


# --------------------------- pure-JAX reference ------------------------------
def ref_forward(x, p):
    hp = functools.partial(jnp.einsum, precision=lax.Precision.HIGHEST)

    def conv1x1(h, w, b):
        return hp('nchw,oc->nohw', h, w) + b[None, :, None, None]

    def gn(h, gamma, beta):
        n, c, hh, ww = h.shape
        hg = h.reshape(n, GROUPS, c // GROUPS, hh, ww)
        m = hg.mean(axis=(2, 3, 4), keepdims=True)
        v = ((hg - m) ** 2).mean(axis=(2, 3, 4), keepdims=True)
        hn = ((hg - m) / jnp.sqrt(v + EPS)).reshape(n, c, hh, ww)
        return hn * gamma[None, :, None, None] + beta[None, :, None, None]

    def tower(h, w, b, g, bt):
        for i in range(NCONV):
            h = jax.nn.relu(gn(conv1x1(h, w[i], b[i]), g[i], bt[i]))
        return h

    def headc(h, w, b):
        return hp('nchw,ochw->no', h, w) + b[None, :]

    h1 = tower(x, p["w1"], p["b1"], p["g1"], p["bt1"])
    h2 = tower(x, p["w2"], p["b2"], p["g2"], p["bt2"])
    cl = headc(h1, p["wcls"], p["bcls"]).reshape(-1, 2, 1, 1)
    op = headc(h2, p["wolp"], p["bolp"]).reshape(-1, 1, 1, 1)
    re = headc(h2, p["wreg"], p["breg"]).reshape(-1, 4, 1, 1)
    return cl, op, re


# ----------------------------------- main ------------------------------------
if __name__ == "__main__":
    key = jax.random.PRNGKey(0)
    k_x, k_x2, k_p = jax.random.split(key, 3)
    params = init_params(k_p)

    def check(x, block_b=BLOCK_B):
        cl, op, re = det_head_forward(x, params, block_b=block_b)
        jax.block_until_ready((cl, op, re))
        cl_r, op_r, re_r = ref_forward(x, params)
        for got, want in ((cl, cl_r), (op, op_r), (re, re_r)):
            assert got.shape == want.shape, (got.shape, want.shape)
            # bf16 MXU inputs + bf16 head weighting -> loosened tolerance vs f32.
            assert jnp.allclose(got, want, rtol=2e-2, atol=3e-3), (got, want)

    # small case: single block (B == N == 2)
    check(jax.random.normal(k_x, (2, FDIM, ROIP, ROIP), jnp.float32))
    # N=20: split into >=2 blocks (B=16) with a partial (OOB-handled) tail block
    check(jax.random.normal(k_x2, (20, FDIM, ROIP, ROIP), jnp.float32))
    # same data, forced small block (B=8, grid=3) to exercise the N > block_b path
    check(jax.random.normal(k_x2, (20, FDIM, ROIP, ROIP), jnp.float32), block_b=8)

    print("KERNEL_OK")
</pallas_src>

<mosaic_0001>
module attributes {stable_mosaic.version = 11 : i64} {
  func.func @det_head_kernel(%arg0: i32, %arg1: memref<2x64x64xf32, #tpu.memory_space<vmem>>, %arg2: memref<64x64xbf16, #tpu.memory_space<vmem>>, %arg3: memref<64x128xbf16, #tpu.memory_space<vmem>>, %arg4: memref<1x128x128xbf16, #tpu.memory_space<vmem>>, %arg5: memref<6x1x128xf32, #tpu.memory_space<vmem>>, %arg6: memref<128x128xf32, #tpu.memory_space<vmem>>, %arg7: memref<5x64x128xbf16, #tpu.memory_space<vmem>>, %arg8: memref<640x128xf32, #tpu.memory_space<vmem>>, %arg9: memref<1x128xf32, #tpu.memory_space<vmem>>, %arg10: memref<2x128xf32, #tpu.memory_space<vmem>>) attributes {dimension_semantics = [#tpu.dimension_semantics<parallel>], iteration_bounds = array<i64: 1>, scalar_prefetch = 0 : i64, scratch_operands = 0 : i64, tpu.core_type = #tpu.core_type<tc>, window_params = [{transform_indices = @transform_0, window_bounds = array<i64: 2, 64, 64>}, {pipeline_mode = #tpu.pipeline_mode<synchronous>, transform_indices = @transform_1, window_bounds = array<i64: 64, 64>}, {pipeline_mode = #tpu.pipeline_mode<synchronous>, transform_indices = @transform_2, window_bounds = array<i64: 64, 128>}, {pipeline_mode = #tpu.pipeline_mode<synchronous>, transform_indices = @transform_3, window_bounds = array<i64: 1, 128, 128>}, {pipeline_mode = #tpu.pipeline_mode<synchronous>, transform_indices = @transform_4, window_bounds = array<i64: 6, 1, 128>}, {pipeline_mode = #tpu.pipeline_mode<synchronous>, transform_indices = @transform_5, window_bounds = array<i64: 128, 128>}, {pipeline_mode = #tpu.pipeline_mode<synchronous>, transform_indices = @transform_6, window_bounds = array<i64: 5, 64, 128>}, {pipeline_mode = #tpu.pipeline_mode<synchronous>, transform_indices = @transform_7, window_bounds = array<i64: 640, 128>}, {pipeline_mode = #tpu.pipeline_mode<synchronous>, transform_indices = @transform_8, window_bounds = array<i64: 1, 128>}, {transform_indices = @transform_9, window_bounds = array<i64: 2, 128>}]} {
    %c0 = arith.constant 0 : index
    %c0_0 = arith.constant 0 : index
    %0 = vector.load %arg6[%c0, %c0_0] : memref<128x128xf32, #tpu.memory_space<vmem>>, vector<128x128xf32>
    %c0_1 = arith.constant 0 : index
    %c0_2 = arith.constant 0 : index
    %c0_3 = arith.constant 0 : index
    %1 = vector.load %arg1[%c0_1, %c0_2, %c0_3] : memref<2x64x64xf32, #tpu.memory_space<vmem>>, vector<2x64x64xf32>
    %2 = arith.truncf %1 : vector<2x64x64xf32> to vector<2x64x64xbf16>
    %c0_4 = arith.constant 0 : index
    %c0_5 = arith.constant 0 : index
    %3 = vector.load %arg2[%c0_4, %c0_5] : memref<64x64xbf16, #tpu.memory_space<vmem>>, vector<64x64xbf16>
    %4 = vector.shape_cast %3 : vector<64x64xbf16> to vector<1x64x64xbf16>
    %5 = vector.broadcast %4 : vector<1x64x64xbf16> to vector<2x64x64xbf16>
    "tpu.trace_start"() <{level = 10 : i32, message = "bhk,bck->bhc"}> : () -> ()
    %cst = arith.constant dense<0.000000e+00> : vector<2x64x64xf32>
    %6 = tpu.matmul %5, %2, %cst {dimension_numbers = #tpu.dot_dimension_numbers<[2], [2], [1], [1], [0, 0, 0, 1, 1, 1], [0], [0]>} : vector<2x64x64xbf16>, vector<2x64x64xbf16>, vector<2x64x64xf32> -> vector<2x64x64xf32>
    "tpu.trace_stop"() : () -> ()
    %7 = vector.shape_cast %6 : vector<2x64x64xf32> to vector<128x64xf32>
    %8 = arith.truncf %7 : vector<128x64xf32> to vector<128x64xbf16>
    %c0_6 = arith.constant 0 : index
    %c0_7 = arith.constant 0 : index
    %9 = vector.load %arg3[%c0_6, %c0_7] : memref<64x128xbf16, #tpu.memory_space<vmem>>, vector<64x128xbf16>
    %cst_8 = arith.constant dense<0.000000e+00> : vector<128x128xf32>
    %10 = tpu.matmul %8, %9, %cst_8 {dimension_numbers = #tpu.dot_dimension_numbers<[1], [0], [0], [1], [0, 0, 1, 1], [], []>} : vector<128x64xbf16>, vector<64x128xbf16>, vector<128x128xf32> -> vector<128x128xf32>
    %c0_9 = arith.constant 0 : index
    %c0_10 = arith.constant 0 : index
    %c0_11 = arith.constant 0 : index
    %11 = vector.load %arg5[%c0_9, %c0_10, %c0_11] : memref<6x1x128xf32, #tpu.memory_space<vmem>>, vector<1x1x128xf32>
    %12 = vector.shape_cast %11 : vector<1x1x128xf32> to vector<1x128xf32>
    %c1 = arith.constant 1 : index
    %c0_12 = arith.constant 0 : index
    %c0_13 = arith.constant 0 : index
    %13 = vector.load %arg5[%c1, %c0_12, %c0_13] : memref<6x1x128xf32, #tpu.memory_space<vmem>>, vector<1x1x128xf32>
    %14 = vector.shape_cast %13 : vector<1x1x128xf32> to vector<1x128xf32>
    %c2 = arith.constant 2 : index
    %c0_14 = arith.constant 0 : index
    %c0_15 = arith.constant 0 : index
    %15 = vector.load %arg5[%c2, %c0_14, %c0_15] : memref<6x1x128xf32, #tpu.memory_space<vmem>>, vector<1x1x128xf32>
    %16 = vector.shape_cast %15 : vector<1x1x128xf32> to vector<1x128xf32>
    %17 = vector.shape_cast %10 : vector<128x128xf32> to vector<2x64x128xf32>
    %cst_16 = arith.constant dense<0.000000e+00> : vector<2x128xf32>
    %18 = vector.multi_reduction <add>, %17, %cst_16 [1] : vector<2x64x128xf32> to vector<2x128xf32>
    %19 = arith.mulf %17, %17 : vector<2x64x128xf32>
    %cst_17 = arith.constant dense<0.000000e+00> : vector<2x128xf32>
    %20 = vector.multi_reduction <add>, %19, %cst_17 [1] : vector<2x64x128xf32> to vector<2x128xf32>
    %cst_18 = arith.constant 6.400000e+01 : f32
    %21 = vector.broadcast %cst_18 : f32 to vector<1x128xf32>
    %22 = arith.mulf %21, %12 : vector<1x128xf32>
    %23 = vector.broadcast %22 : vector<1x128xf32> to vector<2x128xf32>
    %24 = arith.addf %18, %23 : vector<2x128xf32>
    %cst_19 = arith.constant 2.000000e+00 : f32
    %25 = vector.broadcast %cst_19 : f32 to vector<1x128xf32>
    %26 = arith.mulf %25, %12 : vector<1x128xf32>
    %27 = vector.broadcast %26 : vector<1x128xf32> to vector<2x128xf32>
    %28 = arith.mulf %27, %18 : vector<2x128xf32>
    %29 = arith.addf %20, %28 : vector<2x128xf32>
    %30 = arith.mulf %12, %12 : vector<1x128xf32>
    %cst_20 = arith.constant 6.400000e+01 : f32
    %31 = vector.broadcast %cst_20 : f32 to vector<1x128xf32>
    %32 = arith.mulf %31, %30 : vector<1x128xf32>
    %33 = vector.broadcast %32 : vector<1x128xf32> to vector<2x128xf32>
    %34 = arith.addf %29, %33 : vector<2x128xf32>
    %cst_21 = arith.constant dense<0.000000e+00> : vector<2x128xf32>
    %35 = tpu.matmul %24, %0, %cst_21 {dimension_numbers = #tpu.dot_dimension_numbers<[1], [0], [0], [1], [0, 0, 1, 1], [], []>} : vector<2x128xf32>, vector<128x128xf32>, vector<2x128xf32> -> vector<2x128xf32>
    %cst_22 = arith.constant dense<0.000000e+00> : vector<2x128xf32>
    %36 = tpu.matmul %34, %0, %cst_22 {dimension_numbers = #tpu.dot_dimension_numbers<[1], [0], [0], [1], [0, 0, 1, 1], [], []>} : vector<2x128xf32>, vector<128x128xf32>, vector<2x128xf32> -> vector<2x128xf32>
    %37 = arith.mulf %35, %35 : vector<2x128xf32>
    %38 = arith.subf %36, %37 : vector<2x128xf32>
    %cst_23 = arith.constant 0.000000e+00 : f32
    %39 = vector.broadcast %cst_23 : f32 to vector<2x128xf32>
    %40 = arith.maximumf %38, %39 : vector<2x128xf32>
    %cst_24 = arith.constant 9.99999974E-6 : f32
    %41 = vector.broadcast %cst_24 : f32 to vector<2x128xf32>
    %42 = arith.addf %40, %41 : vector<2x128xf32>
    %43 = math.rsqrt %42 : vector<2x128xf32>
    %44 = vector.broadcast %14 : vector<1x128xf32> to vector<2x128xf32>
    %45 = arith.mulf %43, %44 : vector<2x128xf32>
    %46 = vector.broadcast %12 : vector<1x128xf32> to vector<2x128xf32>
    %47 = arith.subf %46, %35 : vector<2x128xf32>
    %48 = arith.mulf %47, %45 : vector<2x128xf32>
    %49 = vector.broadcast %16 : vector<1x128xf32> to vector<2x128xf32>
    %50 = arith.addf %48, %49 : vector<2x128xf32>
    %51 = vector.shape_cast %45 : vector<2x128xf32> to vector<2x1x128xf32>
    %52 = vector.broadcast %51 : vector<2x1x128xf32> to vector<2x64x128xf32>
    %53 = arith.mulf %17, %52 : vector<2x64x128xf32>
    %54 = vector.shape_cast %50 : vector<2x128xf32> to vector<2x1x128xf32>
    %55 = vector.broadcast %54 : vector<2x1x128xf32> to vector<2x64x128xf32>
    %56 = arith.addf %53, %55 : vector<2x64x128xf32>
    %cst_25 = arith.constant 0.000000e+00 : f32
    %57 = vector.broadcast %cst_25 : f32 to vector<2x64x128xf32>
    %58 = arith.maximumf %56, %57 : vector<2x64x128xf32>
    %59 = vector.shape_cast %58 : vector<2x64x128xf32> to vector<128x128xf32>
    %60 = arith.truncf %59 : vector<128x128xf32> to vector<128x128xbf16>
    %c0_26 = arith.constant 0 : index
    %c0_27 = arith.constant 0 : index
    %c0_28 = arith.constant 0 : index
    %61 = vector.load %arg4[%c0_26, %c0_27, %c0_28] : memref<1x128x128xbf16, #tpu.memory_space<vmem>>, vector<1x128x128xbf16>
    %62 = vector.shape_cast %61 : vector<1x128x128xbf16> to vector<128x128xbf16>
    %cst_29 = arith.constant dense<0.000000e+00> : vector<128x128xf32>
    %63 = tpu.matmul %60, %62, %cst_29 {dimension_numbers = #tpu.dot_dimension_numbers<[1], [0], [0], [1], [0, 0, 1, 1], [], []>} : vector<128x128xbf16>, vector<128x128xbf16>, vector<128x128xf32> -> vector<128x128xf32>
    %c3 = arith.constant 3 : index
    %c0_30 = arith.constant 0 : index
    %c0_31 = arith.constant 0 : index
    %64 = vector.load %arg5[%c3, %c0_30, %c0_31] : memref<6x1x128xf32, #tpu.memory_space<vmem>>, vector<1x1x128xf32>
    %65 = vector.shape_cast %64 : vector<1x1x128xf32> to vector<1x128xf32>
    %c4 = arith.constant 4 : index
    %c0_32 = arith.constant 0 : index
    %c0_33 = arith.constant 0 : index
    %66 = vector.load %arg5[%c4, %c0_32, %c0_33] : memref<6x1x128xf32, #tpu.memory_space<vmem>>, vector<1x1x128xf32>
    %67 = vector.shape_cast %66 : vector<1x1x128xf32> to vector<1x128xf32>
    %c5 = arith.constant 5 : index
    %c0_34 = arith.constant 0 : index
    %c0_35 = arith.constant 0 : index
    %68 = vector.load %arg5[%c5, %c0_34, %c0_35] : memref<6x1x128xf32, #tpu.memory_space<vmem>>, vector<1x1x128xf32>
    %69 = vector.shape_cast %68 : vector<1x1x128xf32> to vector<1x128xf32>
    %70 = vector.shape_cast %63 : vector<128x128xf32> to vector<2x64x128xf32>
    %cst_36 = arith.constant dense<0.000000e+00> : vector<2x128xf32>
    %71 = vector.multi_reduction <add>, %70, %cst_36 [1] : vector<2x64x128xf32> to vector<2x128xf32>
    %72 = arith.mulf %70, %70 : vector<2x64x128xf32>
    %cst_37 = arith.constant dense<0.000000e+00> : vector<2x128xf32>
    %73 = vector.multi_reduction <add>, %72, %cst_37 [1] : vector<2x64x128xf32> to vector<2x128xf32>
    %cst_38 = arith.constant 6.400000e+01 : f32
    %74 = vector.broadcast %cst_38 : f32 to vector<1x128xf32>
    %75 = arith.mulf %74, %65 : vector<1x128xf32>
    %76 = vector.broadcast %75 : vector<1x128xf32> to vector<2x128xf32>
    %77 = arith.addf %71, %76 : vector<2x128xf32>
    %cst_39 = arith.constant 2.000000e+00 : f32
    %78 = vector.broadcast %cst_39 : f32 to vector<1x128xf32>
    %79 = arith.mulf %78, %65 : vector<1x128xf32>
    %80 = vector.broadcast %79 : vector<1x128xf32> to vector<2x128xf32>
    %81 = arith.mulf %80, %71 : vector<2x128xf32>
    %82 = arith.addf %73, %81 : vector<2x128xf32>
    %83 = arith.mulf %65, %65 : vector<1x128xf32>
    %cst_40 = arith.constant 6.400000e+01 : f32
    %84 = vector.broadcast %cst_40 : f32 to vector<1x128xf32>
    %85 = arith.mulf %84, %83 : vector<1x128xf32>
    %86 = vector.broadcast %85 : vector<1x128xf32> to vector<2x128xf32>
    %87 = arith.addf %82, %86 : vector<2x128xf32>
    %cst_41 = arith.constant dense<0.000000e+00> : vector<2x128xf32>
    %88 = tpu.matmul %77, %0, %cst_41 {dimension_numbers = #tpu.dot_dimension_numbers<[1], [0], [0], [1], [0, 0, 1, 1], [], []>} : vector<2x128xf32>, vector<128x128xf32>, vector<2x128xf32> -> vector<2x128xf32>
    %cst_42 = arith.constant dense<0.000000e+00> : vector<2x128xf32>
    %89 = tpu.matmul %87, %0, %cst_42 {dimension_numbers = #tpu.dot_dimension_numbers<[1], [0], [0], [1], [0, 0, 1, 1], [], []>} : vector<2x128xf32>, vector<128x128xf32>, vector<2x128xf32> -> vector<2x128xf32>
    %90 = arith.mulf %88, %88 : vector<2x128xf32>
    %91 = arith.subf %89, %90 : vector<2x128xf32>
    %cst_43 = arith.constant 0.000000e+00 : f32
    %92 = vector.broadcast %cst_43 : f32 to vector<2x128xf32>
    %93 = arith.maximumf %91, %92 : vector<2x128xf32>
    %cst_44 = arith.constant 9.99999974E-6 : f32
    %94 = vector.broadcast %cst_44 : f32 to vector<2x128xf32>
    %95 = arith.addf %93, %94 : vector<2x128xf32>
    %96 = math.rsqrt %95 : vector<2x128xf32>
    %97 = vector.broadcast %67 : vector<1x128xf32> to vector<2x128xf32>
    %98 = arith.mulf %96, %97 : vector<2x128xf32>
    %99 = vector.broadcast %65 : vector<1x128xf32> to vector<2x128xf32>
    %100 = arith.subf %99, %88 : vector<2x128xf32>
    %101 = arith.mulf %100, %98 : vector<2x128xf32>
    %102 = vector.broadcast %69 : vector<1x128xf32> to vector<2x128xf32>
    %103 = arith.addf %101, %102 : vector<2x128xf32>
    %104 = vector.shape_cast %98 : vector<2x128xf32> to vector<2x1x128xf32>
    %105 = vector.broadcast %104 : vector<2x1x128xf32> to vector<2x64x128xf32>
    %106 = arith.mulf %70, %105 : vector<2x64x128xf32>
    %107 = vector.shape_cast %103 : vector<2x128xf32> to vector<2x1x128xf32>
    %108 = vector.broadcast %107 : vector<2x1x128xf32> to vector<2x64x128xf32>
    %109 = arith.addf %106, %108 : vector<2x64x128xf32>
    %cst_45 = arith.constant 0.000000e+00 : f32
    %110 = vector.broadcast %cst_45 : f32 to vector<2x64x128xf32>
    %111 = arith.maximumf %109, %110 : vector<2x64x128xf32>
    %112 = arith.truncf %111 : vector<2x64x128xf32> to vector<2x64x128xbf16>
    %c0_46 = arith.constant 0 : index
    %c0_47 = arith.constant 0 : index
    %c0_48 = arith.constant 0 : index
    %113 = vector.load %arg7[%c0_46, %c0_47, %c0_48] : memref<5x64x128xbf16, #tpu.memory_space<vmem>>, vector<1x64x128xbf16>
    %114 = vector.shape_cast %113 : vector<1x64x128xbf16> to vector<64x128xbf16>
    %115 = vector.shape_cast %114 : vector<64x128xbf16> to vector<1x64x128xbf16>
    %116 = vector.broadcast %115 : vector<1x64x128xbf16> to vector<2x64x128xbf16>
    %117 = arith.mulf %112, %116 : vector<2x64x128xbf16>
    %118 = arith.extf %117 : vector<2x64x128xbf16> to vector<2x64x128xf32>
    %cst_49 = arith.constant dense<0.000000e+00> : vector<2x128xf32>
    %119 = vector.multi_reduction <add>, %118, %cst_49 [1] : vector<2x64x128xf32> to vector<2x128xf32>
    %c1_50 = arith.constant 1 : index
    %c0_51 = arith.constant 0 : index
    %c0_52 = arith.constant 0 : index
    %120 = vector.load %arg7[%c1_50, %c0_51, %c0_52] : memref<5x64x128xbf16, #tpu.memory_space<vmem>>, vector<1x64x128xbf16>
    %121 = vector.shape_cast %120 : vector<1x64x128xbf16> to vector<64x128xbf16>
    %122 = vector.shape_cast %121 : vector<64x128xbf16> to vector<1x64x128xbf16>
    %123 = vector.broadcast %122 : vector<1x64x128xbf16> to vector<2x64x128xbf16>
    %124 = arith.mulf %112, %123 : vector<2x64x128xbf16>
    %125 = arith.extf %124 : vector<2x64x128xbf16> to vector<2x64x128xf32>
    %cst_53 = arith.constant dense<0.000000e+00> : vector<2x128xf32>
    %126 = vector.multi_reduction <add>, %125, %cst_53 [1] : vector<2x64x128xf32> to vector<2x128xf32>
    %c2_54 = arith.constant 2 : index
    %c0_55 = arith.constant 0 : index
    %c0_56 = arith.constant 0 : index
    %127 = vector.load %arg7[%c2_54, %c0_55, %c0_56] : memref<5x64x128xbf16, #tpu.memory_space<vmem>>, vector<1x64x128xbf16>
    %128 = vector.shape_cast %127 : vector<1x64x128xbf16> to vector<64x128xbf16>
    %129 = vector.shape_cast %128 : vector<64x128xbf16> to vector<1x64x128xbf16>
    %130 = vector.broadcast %129 : vector<1x64x128xbf16> to vector<2x64x128xbf16>
    %131 = arith.mulf %112, %130 : vector<2x64x128xbf16>
    %132 = arith.extf %131 : vector<2x64x128xbf16> to vector<2x64x128xf32>
    %cst_57 = arith.constant dense<0.000000e+00> : vector<2x128xf32>
    %133 = vector.multi_reduction <add>, %132, %cst_57 [1] : vector<2x64x128xf32> to vector<2x128xf32>
    %c3_58 = arith.constant 3 : index
    %c0_59 = arith.constant 0 : index
    %c0_60 = arith.constant 0 : index
    %134 = vector.load %arg7[%c3_58, %c0_59, %c0_60] : memref<5x64x128xbf16, #tpu.memory_space<vmem>>, vector<1x64x128xbf16>
    %135 = vector.shape_cast %134 : vector<1x64x128xbf16> to vector<64x128xbf16>
    %136 = vector.shape_cast %135 : vector<64x128xbf16> to vector<1x64x128xbf16>
    %137 = vector.broadcast %136 : vector<1x64x128xbf16> to vector<2x64x128xbf16>
    %138 = arith.mulf %112, %137 : vector<2x64x128xbf16>
    %139 = arith.extf %138 : vector<2x64x128xbf16> to vector<2x64x128xf32>
    %cst_61 = arith.constant dense<0.000000e+00> : vector<2x128xf32>
    %140 = vector.multi_reduction <add>, %139, %cst_61 [1] : vector<2x64x128xf32> to vector<2x128xf32>
    %c4_62 = arith.constant 4 : index
    %c0_63 = arith.constant 0 : index
    %c0_64 = arith.constant 0 : index
    %141 = vector.load %arg7[%c4_62, %c0_63, %c0_64] : memref<5x64x128xbf16, #tpu.memory_space<vmem>>, vector<1x64x128xbf16>
    %142 = vector.shape_cast %141 : vector<1x64x128xbf16> to vector<64x128xbf16>
    %143 = vector.shape_cast %142 : vector<64x128xbf16> to vector<1x64x128xbf16>
    %144 = vector.broadcast %143 : vector<1x64x128xbf16> to vector<2x64x128xbf16>
    %145 = arith.mulf %112, %144 : vector<2x64x128xbf16>
    %146 = arith.extf %145 : vector<2x64x128xbf16> to vector<2x64x128xf32>
    %cst_65 = arith.constant dense<0.000000e+00> : vector<2x128xf32>
    %147 = vector.multi_reduction <add>, %146, %cst_65 [1] : vector<2x64x128xf32> to vector<2x128xf32>
    %148 = tpu.concatenate %119, %126, %133, %140, %147 in 1 : vector<2x128xf32>, vector<2x128xf32>, vector<2x128xf32>, vector<2x128xf32>, vector<2x128xf32> -> vector<2x640xf32>
    %c0_66 = arith.constant 0 : index
    %c0_67 = arith.constant 0 : index
    %149 = vector.load %arg8[%c0_66, %c0_67] : memref<640x128xf32, #tpu.memory_space<vmem>>, vector<640x128xf32>
    %cst_68 = arith.constant dense<0.000000e+00> : vector<2x128xf32>
    %150 = tpu.matmul %148, %149, %cst_68 {dimension_numbers = #tpu.dot_dimension_numbers<[1], [0], [0], [1], [0, 0, 1, 1], [], []>} : vector<2x640xf32>, vector<640x128xf32>, vector<2x128xf32> -> vector<2x128xf32>
    %c0_69 = arith.constant 0 : index
    %c0_70 = arith.constant 0 : index
    %151 = vector.load %arg9[%c0_69, %c0_70] : memref<1x128xf32, #tpu.memory_space<vmem>>, vector<1x128xf32>
    %152 = vector.broadcast %151 : vector<1x128xf32> to vector<2x128xf32>
    %153 = arith.addf %150, %152 : vector<2x128xf32>
    %c0_71 = arith.constant 0 : index
    %c0_72 = arith.constant 0 : index
    %154 = vector.load %arg10[%c0_71, %c0_72] : memref<2x128xf32, #tpu.memory_space<vmem>>, vector<2x128xf32>
    tpu.vector_store %arg10[%c0_71, %c0_72], %153 {strides = array<i32>} : memref<2x128xf32, #tpu.memory_space<vmem>>, vector<2x128xf32>,
    return
  }
  func.func @transform_0(%arg0: i32) -> (i32, i32, i32) {
    %c0_i32 = arith.constant 0 : i32
    %c0_i32_0 = arith.constant 0 : i32
    %c0_i32_1 = arith.constant 0 : i32
    return %arg0, %c0_i32, %c0_i32_0 : i32, i32, i32
  }
  func.func @transform_1(%arg0: i32) -> (i32, i32) {
    %c0_i32 = arith.constant 0 : i32
    %c0_i32_0 = arith.constant 0 : i32
    %c0_i32_1 = arith.constant 0 : i32
    return %c0_i32, %c0_i32_0 : i32, i32
  }
  func.func @transform_2(%arg0: i32) -> (i32, i32) {
    %c0_i32 = arith.constant 0 : i32
    %c0_i32_0 = arith.constant 0 : i32
    %c0_i32_1 = arith.constant 0 : i32
    return %c0_i32, %c0_i32_0 : i32, i32
  }
  func.func @transform_3(%arg0: i32) -> (i32, i32, i32) {
    %c0_i32 = arith.constant 0 : i32
    %c0_i32_0 = arith.constant 0 : i32
    %c0_i32_1 = arith.constant 0 : i32
    %c0_i32_2 = arith.constant 0 : i32
    return %c0_i32, %c0_i32_0, %c0_i32_1 : i32, i32, i32
  }
  func.func @transform_4(%arg0: i32) -> (i32, i32, i32) {
    %c0_i32 = arith.constant 0 : i32
    %c0_i32_0 = arith.constant 0 : i32
    %c0_i32_1 = arith.constant 0 : i32
    %c0_i32_2 = arith.constant 0 : i32
    return %c0_i32, %c0_i32_0, %c0_i32_1 : i32, i32, i32
  }
  func.func @transform_5(%arg0: i32) -> (i32, i32) {
    %c0_i32 = arith.constant 0 : i32
    %c0_i32_0 = arith.constant 0 : i32
    %c0_i32_1 = arith.constant 0 : i32
    return %c0_i32, %c0_i32_0 : i32, i32
  }
  func.func @transform_6(%arg0: i32) -> (i32, i32, i32) {
    %c0_i32 = arith.constant 0 : i32
    %c0_i32_0 = arith.constant 0 : i32
    %c0_i32_1 = arith.constant 0 : i32
    %c0_i32_2 = arith.constant 0 : i32
    return %c0_i32, %c0_i32_0, %c0_i32_1 : i32, i32, i32
  }
  func.func @transform_7(%arg0: i32) -> (i32, i32) {
    %c0_i32 = arith.constant 0 : i32
    %c0_i32_0 = arith.constant 0 : i32
    %c0_i32_1 = arith.constant 0 : i32
    return %c0_i32, %c0_i32_0 : i32, i32
  }
  func.func @transform_8(%arg0: i32) -> (i32, i32) {
    %c0_i32 = arith.constant 0 : i32
    %c0_i32_0 = arith.constant 0 : i32
    %c0_i32_1 = arith.constant 0 : i32
    return %c0_i32, %c0_i32_0 : i32, i32
  }
  func.func @transform_9(%arg0: i32) -> (i32, i32) {
    %c0_i32 = arith.constant 0 : i32
    %c0_i32_0 = arith.constant 0 : i32
    return %arg0, %c0_i32 : i32, i32
  }
}

</mosaic_0001>

<bundles_post_ra>
// kernel: tpu_custom_call.1
= control target key start
LH: loop header
LB: loop body
LE: loop exit
PB: predicated region body
PF: predicated region fallthrough
CT: control target
= control target key end

     0   :  { %14 = vsyncpa [#allocation3], 0  ;;  %s2828_s0 = inlined_call_operand.hbm [shape: f32[2,64,64], index: 0, kind: input, shape index: {}]   ;;  %s2829_s1 = inlined_call_operand.hbm [shape: bf16[64,64], index: 1, kind: input, shape index: {}]   ;;  %s2830_s2 = inlined_call_operand.hbm [shape: bf16[64,128], index: 2, kind: input, shape index: {}]   ;;  %s2831_s3 = inlined_call_operand.hbm [shape: bf16[1,128,128], index: 3, kind: input, shape index: {}]   ;;  %s2832_s4 = inlined_call_operand.hbm [shape: f32[6,1,128], index: 4, kind: input, shape index: {}]   ;;  %s2833_s5 = inlined_call_operand.hbm [shape: f32[128,128], index: 5, kind: input, shape index: {}]   ;;  %s2834_s6 = inlined_call_operand.hbm [shape: bf16[5,64,128], index: 6, kind: input, shape index: {}]   ;;  %s2835_s7 = inlined_call_operand.hbm [shape: f32[640,128], index: 7, kind: input, shape index: {}]   ;;  %s2836_s8 = inlined_call_operand.vmem [shape: f32[1,128], index: 8, kind: input, shape index: {}]   ;;  %s2837_s9 = inlined_call_operand.hbm [shape: f32[2,128], index: 9, kind: output, shape index: {}]  }
   0x1   :  { %15 = vsyncpa [#allocation6], 0 }
   0x2   :  { %16 = vsyncpa [#allocation9], 0 }
   0x3   :  { %17 = vsyncpa [#allocation12], 0 }
   0x4   :  { %18 = vsyncpa [#allocation15], 0  ;;  %s37_s11 = sshll.u32 %s2829_s1, 4  ;;  %s38_s11 = int_to_ptr.hbm [resolvable:$true] %s37_s11 }
   0x5   :  { %19 = vsyncpa [#allocation4], 0  ;;  %s2207_s12 = smov [#allocation5]   ;;  %s63_s16 = sshll.u32 %s2831_s3, 4  ;;  %s64_s16 = int_to_ptr.hbm [resolvable:$true] %s63_s16 }
   0x6   :  { %s39_s13 = sshll.u32 %s2207_s12, 4  ;;  %s2208_s17 = smov 64   ;;  %s40_s13 = int_to_ptr.vmem [resolvable:$true] %s39_s13 }
   0x7   :  { %s2209_s18 = smov 4   ;;  %s2210_s19 = smov [#allocation8]  }
   0x8   :  { %45 = dma.hbm_to_vmem [thread:$0]  %s38_s11, 512, %s40_s13, [#allocation6], %s2208_s17, %s2208_s17, %s2209_s18  }
   0x9   :  { %s65_s20 = sshll.u32 %s2210_s19, 4  ;;  %s89_s22 = sshll.u32 %s2833_s5, 4  ;;  %s66_s20 = int_to_ptr.vmem [resolvable:$true] %s65_s20  ;;  %s90_s22 = int_to_ptr.hbm [resolvable:$true] %s89_s22 }
   0xa   :  { %71 = dma.hbm_to_vmem [thread:$0]  %s64_s16, 1024, %s66_s20, [#allocation9], %s2208_s17, %s2208_s17, %s2209_s18  }
   0xb   :  { %s2211_s3 = smov [#allocation11]   ;;  %s24_s26 = sshll.u32 %s2828_s0, 4  ;;  %s25_s26 = int_to_ptr.hbm [resolvable:$true] %s24_s26 }
   0xc   :  { %s91_s23 = sshll.u32 %s2211_s3, 4  ;;  %s2212_s27 = smov 128   ;;  %s92_s23 = int_to_ptr.vmem [resolvable:$true] %s91_s23 }
   0xd   :  { %s2213_s28 = smov 8   ;;  %s2214_s29 = smov [#allocation2]  }
   0xe   :  { %97 = dma.hbm_to_vmem [thread:$0]  %s90_s22, 2048, %s92_s23, [#allocation12], %s2212_s27, %s2212_s27, %s2213_s28  }
   0xf   :  { %s26_s30 = sshll.u32 %s2214_s29, 4  ;;  %s50_s5 = sshll.u32 %s2830_s2, 4  ;;  %s27_s30 = int_to_ptr.vmem [resolvable:$true] %s26_s30  ;;  %s51_s5 = int_to_ptr.hbm [resolvable:$true] %s50_s5 }
  0x10   :  { %32 = dma.hbm_to_vmem [thread:$0]  %s25_s26, 2048, %s27_s30, [#allocation3], %s2212_s27, %s2212_s27, %s2213_s28  }
  0x11   :  { %s76_s13 = sshll.u32 %s2832_s4, 4  ;;  %s2215_s14 = smov [#allocation7]   ;;  %s77_s13 = int_to_ptr.hbm [resolvable:$true] %s76_s13 }
  0x12   :  { %s52_s15 = sshll.u32 %s2215_s14, 4  ;;  %s2216_s16 = smov [#allocation10]   ;;  %s53_s15 = int_to_ptr.vmem [resolvable:$true] %s52_s15 }
  0x13   :  { %58 = dma.hbm_to_vmem [thread:$0]  %s51_s5, 512, %s53_s15, [#allocation6], %s2208_s17, %s2208_s17, %s2209_s18  }
  0x14   :  { %s78_s2 = sshll.u32 %s2216_s16, 4  ;;  %s2217_s19 = smov 16   ;;  %s79_s2 = int_to_ptr.vmem [resolvable:$true] %s78_s2 }
  0x15   :  { %s2218_s20 = smov 1   ;;  %s102_s22 = sshll.u32 %s2834_s6, 4  ;;  %s103_s22 = int_to_ptr.hbm [resolvable:$true] %s102_s22 }
  0x16   :  { %84 = dma.hbm_to_vmem [thread:$0]  %s77_s13, 96, %s79_s2, [#allocation9], %s2217_s19, %s2217_s19, %s2218_s20  }
  0x17   :  { %s2219_s4 = smov [#allocation13]   ;;  %s115_s25 = sshll.u32 %s2835_s7, 4  ;;  %s116_s25 = int_to_ptr.hbm [resolvable:$true] %s115_s25 }
  0x18   :  { %s104_s3 = sshll.u32 %s2219_s4, 4  ;;  %s2220_s26 = smov [#allocation14]   ;;  %s105_s3 = int_to_ptr.vmem [resolvable:$true] %s104_s3 }
  0x19   :  { %110 = dma.hbm_to_vmem [thread:$0]  %s103_s22, 2560, %s105_s3, [#allocation12], %s2208_s17, %s2208_s17, %s2209_s18  }
  0x1a   :  { %s117_s29 = sshll.u32 %s2220_s26, 4  ;;  %s118_s29 = int_to_ptr.vmem [resolvable:$true] %s117_s29 }
  0x1b   :  { %123 = dma.hbm_to_vmem [thread:$0]  %s116_s25, 10240, %s118_s29, [#allocation15], %s2212_s27, %s2212_s27, %s2213_s28  }
  0x1c   :  { %2195 = dma.done.wait [#allocation3], 2048  }
  0x1d   :  { %2196 = vsyncadd [#allocation3], 4294965248 }
  0x1e   :  { %2197 = dma.done.wait [#allocation6], 1024  }
  0x1f   :  { %2198 = vsyncadd [#allocation6], 4294966272 }
  0x20   :  { %2199 = dma.done.wait [#allocation9], 1120  }
  0x21   :  { %2200 = vsyncadd [#allocation9], 4294966176 }
  0x22   :  { %2201 = dma.done.wait [#allocation12], 4608  }
  0x23   :  { %2202 = vsyncadd [#allocation12], 4294962688 }
  0x24   :  { %2203 = dma.done.wait [#allocation15], 10240  }
  0x25   :  { %2204 = vsyncadd [#allocation15], 4294957056  ;;  %v181_v0 = vld [vmem:[#allocation2 + $0x30] sm:$0xff]  ;;  %v182_v1 = vld [vmem:[#allocation2 + $0x38] sm:$0xff]  ;;  %vm255_vm0 = vcmask 523264   ;;  %vm568_vm1 = vcmask 1041409  }
  0x26   :  { %v179_v2 = vld [vmem:[#allocation2 + $0x20] sm:$0xff]  ;;  %v197_v3 = vpack.c.bf16 %v181_v0, %v181_v0  ;;  %v198_v4 = vpack.c.bf16 %v182_v1, %v182_v1  ;;  %v180_v5 = vld [vmem:[#allocation2 + $0x28] sm:$0xff]  ;;  %v177_v13 = vld [vmem:[#allocation2 + $0x10] sm:$0xff]  ;;  %s2221_s17 = smov [#allocation16]   ;;  %s1740_s30 = sshll.u32 %s2837_s9, 4  ;;  %s1741_s30 = int_to_ptr.hbm [resolvable:$true] %s1740_s30 }
  0x27   :  { %v195_v6 = vpack.c.bf16 %v179_v2, %v179_v2  ;;  %v196_v7 = vpack.c.bf16 %v180_v5, %v180_v5  ;;  %v178_v14 = vld [vmem:[#allocation2 + $0x18] sm:$0xff]  ;;  %v193_v17 = vpack.c.bf16 %v177_v13, %v177_v13  ;;  %v175_v22 = vld [vmem:[#allocation2] sm:$0xff]  ;;  %v176_v23 = vld [vmem:[#allocation2 + $0x8] sm:$0xff]  ;;  %s1738_s18 = sshll.u32 %s2221_s17, 4  ;;  %s1739_s18 = int_to_ptr.vmem [resolvable:$true] %s1738_s18 }
  0x28   :  { %v249_v8 = vunpack.c.l.b16 %v197_v3  ;;  %v250_v9 = vunpack.c.l.b16 %v198_v4  ;;  %v194_v18 = vpack.c.bf16 %v178_v14, %v178_v14  ;;  %v191_v25 = vpack.c.bf16 %v175_v22, %v175_v22  ;;  %v189_v30 = vld [vmem:[#allocation2 + $0x70] sm:$0xff]  ;;  %v190_v31 = vld [vmem:[#allocation2 + $0x78] sm:$0xff]  ;;  %v187_v40 = vld [vmem:[#allocation2 + $0x60] sm:$0xff] }
  0x29   :  { %v247_v11 = vunpack.c.l.b16 %v195_v6  ;;  %v248_v12 = vunpack.c.l.b16 %v196_v7  ;;  %v245_v20 = vunpack.c.l.b16 %v193_v17  ;;  %v192_v26 = vpack.c.bf16 %v176_v23, %v176_v23  ;;  %v188_v41 = vld [vmem:[#allocation2 + $0x68] sm:$0xff]  ;;  %v1834_v44 = vld [vmem:[#allocation5] sm:$0xff]  ;;  %v185_v49 = vld [vmem:[#allocation2 + $0x50] sm:$0xff] }
  0x2a   :  { %v254_v10 = vpack.c.b16 %v250_v9, %v249_v8  ;;  %v246_v21 = vunpack.c.l.b16 %v194_v18  ;;  %v243_v28 = vunpack.c.l.b16 %v191_v25  ;;  %v205_v32 = vpack.c.bf16 %v189_v30, %v189_v30  ;;  %v186_v50 = vld [vmem:[#allocation2 + $0x58] sm:$0xff]  ;;  %v183_v57 = vld [vmem:[#allocation2 + $0x40] sm:$0xff]  ;;  %v184_v58 = vld [vmem:[#allocation2 + $0x48] sm:$0xff] }
  0x2b   :  { %v253_v16 = vpack.c.b16 %v248_v12, %v247_v11  ;;  %v244_v29 = vunpack.c.l.b16 %v192_v26  ;;  %v206_v33 = vpack.c.bf16 %v190_v31, %v190_v31  ;;  %v203_v42 = vpack.c.bf16 %v187_v40, %v187_v40  ;;  %v1835_v61 = vld [vmem:[#allocation5 + $0x8] sm:$0xff]  ;;  %v1836_v2 = vld [vmem:[#allocation5 + $0x10] sm:$0xff]  ;;  %v1841_v3 = vld [vmem:[#allocation7 + $0x18] sm:$0xff] }
  0x2c   :  { %v278_v15 = vsel %vm255_vm0, %v254_v10, 0  ;;  %v252_v24 = vpack.c.b16 %v246_v21, %v245_v20  ;;  %v323_v35 = vunpack.c.l.b16 %v205_v32  ;;  %v204_v43 = vpack.c.bf16 %v188_v41, %v188_v41  ;;  %438 = vmatpush.bf16.msra.mxu2 %v1841_v3  ;;  %v1837_v4 = vld [vmem:[#allocation5 + $0x18] sm:$0xff]  ;;  %v1840_v5 = vld [vmem:[#allocation7 + $0x10] sm:$0xff]  ;;  %v1839_v6 = vld [vmem:[#allocation7 + $0x8] sm:$0xff] }
  0x2d   :  { %284 = vmatpush.bf16.xpose.msra.mxu0 %v278_v15  ;;  %v275_v19 = vsel %vm255_vm0, %v253_v16, 0  ;;  %v251_v34 = vpack.c.b16 %v244_v29, %v243_v28  ;;  %v324_v36 = vunpack.c.l.b16 %v206_v33  ;;  %v321_v45 = vunpack.c.l.b16 %v203_v42  ;;  %v1838_v7 = vld [vmem:[#allocation7] sm:$0xff]  ;;  %v2359_v40 = vld [vmem:[#allocation11 + $0x70] sm:$0xff]  ;;  %v2365_v42 = vld [vmem:[#allocation11 + $0x68] sm:$0xff] }
  0x2e   :  { %v272_v27 = vsel %vm255_vm0, %v252_v24, 0  ;;  %v322_v46 = vunpack.c.l.b16 %v204_v43  ;;  %v201_v51 = vpack.c.bf16 %v185_v49, %v185_v49  ;;  %v202_v52 = vpack.c.bf16 %v186_v50, %v186_v50  ;;  %v2369_v43 = vld [vmem:[#allocation11 + $0x60] sm:$0xff]  ;;  %v2389_v49 = vld [vmem:[#allocation11 + $0x38] sm:$0xff]  ;;  %v2395_v50 = vld [vmem:[#allocation11 + $0x30] sm:$0xff] }
  0x2f   :  { %v328_v37 = vpack.c.b16 %v324_v36, %v323_v35  ;;  %v269_v38 = vsel %vm255_vm0, %v251_v34, 0  ;;  %v199_v59 = vpack.c.bf16 %v183_v57, %v183_v57  ;;  %v200_v60 = vpack.c.bf16 %v184_v58, %v184_v58  ;;  %v2419_v57 = vld [vmem:[#allocation11 + $0x8] sm:$0xff]  ;;  %v2423_v58 = vld [vmem:[#allocation11] sm:$0xff] }
  0x30   :  { %v327_v47 = vpack.c.b16 %v322_v46, %v321_v45  ;;  %v319_v53 = vunpack.c.l.b16 %v201_v51  ;;  %v320_v54 = vunpack.c.l.b16 %v202_v52  ;;  %439 = vmatpush.bf16.msra.mxu2 %v1840_v5  ;;  %v2377_v45 = vld [vmem:[#allocation11 + $0x50] sm:$0xff]  ;;  %v2401_v52 = vld [vmem:[#allocation11 + $0x28] sm:$0xff] }
  0x31   :  { %v339_v39 = vsel %vm255_vm0, %v328_v37, 0  ;;  %v317_v62 = vunpack.c.l.b16 %v199_v59  ;;  %v318_v63 = vunpack.c.l.b16 %v200_v60 }
  0x32   :  { %345 = vmatpush.bf16.xpose.msra.mxu1 %v339_v39  ;;  %v336_v48 = vsel %vm255_vm0, %v327_v47, 0  ;;  %v326_v55 = vpack.c.b16 %v320_v54, %v319_v53  ;;  %v2355_v39 = vld [vmem:[#allocation11 + $0x78] sm:$0xff]  ;;  %v2383_v47 = vld [vmem:[#allocation11 + $0x48] sm:$0xff]  ;;  %v2405_v53 = vld [vmem:[#allocation11 + $0x20] sm:$0xff] }
  0x33   :  { %v325_v0 = vpack.c.b16 %v318_v63, %v317_v62  ;;  %590 = vmatpush.msra.mxu3 %v2355_v39  ;;  %v2407_v54 = vld [vmem:[#allocation11 + $0x18] sm:$0xff] }
  0x34   :  { %v333_v56 = vsel %vm255_vm0, %v326_v55, 0  ;;  %440 = vmatpush.bf16.msra.mxu2 %v1839_v6  ;;  %v2413_v55 = vld [vmem:[#allocation11 + $0x10] sm:$0xff] }
  0x35   :  { %285 = vmatpush.bf16.xpose.msra.mxu0 %v275_v19  ;;  %v330_v1 = vsel %vm255_vm0, %v325_v0, 0  ;;  %591 = vmatpush.msra.mxu3 %v2359_v40 }
  0x37   :  { %592 = vmatpush.msra.mxu3 %v2365_v42 }
  0x38   :  { %441 = vmatpush.bf16.msra.mxu2 %v1838_v7 }
  0x39   :  { %593 = vmatpush.msra.mxu3 %v2369_v43 }
  0x3a   :  { %346 = vmatpush.bf16.xpose.msra.mxu1 %v336_v48  ;;  %v2387_v48 = vld [vmem:[#allocation11 + $0x40] sm:$0xff] }
  0x3d   :  { %286 = vmatpush.bf16.xpose.msra.mxu0 %v272_v27 }
  0x42   :  { %347 = vmatpush.bf16.xpose.msra.mxu1 %v333_v56 }
  0x45   :  { %287 = vmatpush.bf16.xpose.msra.mxu0 %v269_v38 }
  0x4a   :  { %348 = vmatpush.bf16.xpose.msra.mxu1 %v330_v1 }
  0x4c   :  { %1770 = vmatmul.msk.bf16.vlgmr.msra.gmra.mxu0 %vm255_vm0, %v1834_v44 }
  0x51   :  { %1774 = vmatmul.msk.bf16.vlgmr.msra.gmra.mxu1 %vm255_vm0, %v1834_v44  ;;  %v2371_v44 = vld [vmem:[#allocation11 + $0x58] sm:$0xff] }
  0x52   :  { %950 = vmatpush.msrb.mxu1 %v2355_v39  ;;  %594 = vmatpush.msra.mxu3 %v2371_v44 }
  0x54   :  { %951 = vmatpush.msrb.mxu1 %v2359_v40  ;;  %595 = vmatpush.msra.mxu3 %v2377_v45 }
  0x56   :  { %952 = vmatpush.msrb.mxu1 %v2365_v42  ;;  %596 = vmatpush.msra.mxu3 %v2383_v47 }
  0x58   :  { %953 = vmatpush.msrb.mxu1 %v2369_v43  ;;  %597 = vmatpush.msra.mxu3 %v2387_v48 }
  0x5a   :  { %954 = vmatpush.msrb.mxu1 %v2371_v44  ;;  %598 = vmatpush.msra.mxu3 %v2389_v49 }
  0x5c   :  { %1771 = vmatmul.msk.bf16.gmra.mxu0 %vm255_vm0, %v1835_v61  ;;  %955 = vmatpush.msrb.mxu1 %v2377_v45 }
  0x5d   :  { %599 = vmatpush.msra.mxu3 %v2395_v50 }
  0x5e   :  { %956 = vmatpush.msrb.mxu1 %v2383_v47 }
  0x5f   :  { %600 = vmatpush.msra.mxu3 %v2401_v52 }
  0x60   :  { %957 = vmatpush.msrb.mxu1 %v2387_v48 }
  0x61   :  { %1775 = vmatmul.msk.bf16.gmra.mxu1 %vm255_vm0, %v1835_v61  ;;  %601 = vmatpush.msra.mxu3 %v2405_v53 }
  0x62   :  { %958 = vmatpush.msrb.mxu1 %v2389_v49 }
  0x63   :  { %602 = vmatpush.msra.mxu3 %v2407_v54 }
  0x64   :  { %959 = vmatpush.msrb.mxu1 %v2395_v50 }
  0x65   :  { %603 = vmatpush.msra.mxu3 %v2413_v55 }
  0x66   :  { %960 = vmatpush.msrb.mxu1 %v2401_v52 }
  0x67   :  { %604 = vmatpush.msra.mxu3 %v2419_v57 }
  0x68   :  { %961 = vmatpush.msrb.mxu1 %v2405_v53 }
  0x69   :  { %605 = vmatpush.msra.mxu3 %v2423_v58 }
  0x6a   :  { %962 = vmatpush.msrb.mxu1 %v2407_v54 }
  0x6b   :  { %615 = vmatpush.msrb.mxu3 %v2355_v39 }
  0x6c   :  { %1772 = vmatmul.msk.bf16.gmra.mxu0 %vm255_vm0, %v1836_v2  ;;  %963 = vmatpush.msrb.mxu1 %v2413_v55 }
  0x6d   :  { %616 = vmatpush.msrb.mxu3 %v2359_v40 }
  0x6e   :  { %964 = vmatpush.msrb.mxu1 %v2419_v57 }
  0x6f   :  { %617 = vmatpush.msrb.mxu3 %v2365_v42 }
  0x70   :  { %965 = vmatpush.msrb.mxu1 %v2423_v58 }
  0x71   :  { %1776 = vmatmul.msk.bf16.gmra.mxu1 %vm255_vm0, %v1836_v2  ;;  %618 = vmatpush.msrb.mxu3 %v2369_v43 }
  0x73   :  { %619 = vmatpush.msrb.mxu3 %v2371_v44 }
  0x75   :  { %620 = vmatpush.msrb.mxu3 %v2377_v45 }
  0x77   :  { %621 = vmatpush.msrb.mxu3 %v2383_v47 }
  0x79   :  { %622 = vmatpush.msrb.mxu3 %v2387_v48 }
  0x7b   :  { %623 = vmatpush.msrb.mxu3 %v2389_v49 }
  0x7c   :  { %1773 = vmatmul.msk.bf16.gmra.mxu0 %vm255_vm0, %v1837_v4 }
  0x7d   :  { %624 = vmatpush.msrb.mxu3 %v2395_v50 }
  0x7f   :  { %625 = vmatpush.msrb.mxu3 %v2401_v52 }
  0x81   :  { %1777 = vmatmul.msk.bf16.gmra.mxu1 %vm255_vm0, %v1837_v4  ;;  %626 = vmatpush.msrb.mxu3 %v2405_v53 }
  0x83   :  { %627 = vmatpush.msrb.mxu3 %v2407_v54 }
  0x85   :  { %628 = vmatpush.msrb.mxu3 %v2413_v55 }
  0x87   :  { %629 = vmatpush.msrb.mxu3 %v2419_v57 }
  0x89   :  { %630 = vmatpush.msrb.mxu3 %v2423_v58 }
  0xc9   :  { %v289_v8 = vpop.f32.mrf.mxu0 }
  0xce   :  { %v350_v18 = vpop.f32.mrf.mxu1 }
  0xd1   :  { %v291_v9 = vpop.f32.mrf.mxu0 }
  0xd2   :  { %v370_v10 = vpack.c.bf16 %v291_v9, %v289_v8 }
  0xd4   :  { %1794 = vmatmul.msk.bf16.vlgmr.msra.gmra.mxu2 %vm255_vm0, %v370_v10 }
  0xd6   :  { %v352_v21 = vpop.f32.mrf.mxu1 }
  0xd7   :  { %v374_v23 = vpack.c.bf16 %v352_v21, %v350_v18 }
  0xd9   :  { %v294_v11 = vpop.f32.mrf.mxu0 }
  0xde   :  { %v355_v22 = vpop.f32.mrf.mxu1 }
  0xe1   :  { %v296_v12 = vpop.f32.mrf.mxu0 }
  0xe2   :  { %v371_v13 = vpack.c.bf16 %v296_v12, %v294_v11 }
  0xe4   :  { %1795 = vmatmul.msk.bf16.gmra.mxu2 %vm255_vm0, %v371_v13 }
  0xe6   :  { %v357_v24 = vpop.f32.mrf.mxu1 }
  0xe7   :  { %v375_v26 = vpack.c.bf16 %v357_v24, %v355_v22 }
  0xe9   :  { %v299_v14 = vpop.f32.mrf.mxu0 }
  0xee   :  { %v360_v25 = vpop.f32.mrf.mxu1 }
  0xf1   :  { %v301_v15 = vpop.f32.mrf.mxu0 }
  0xf2   :  { %v372_v16 = vpack.c.bf16 %v301_v15, %v299_v14 }
  0xf4   :  { %1796 = vmatmul.msk.bf16.gmra.mxu2 %vm255_vm0, %v372_v16 }
  0xf6   :  { %v362_v27 = vpop.f32.mrf.mxu1 }
  0xf7   :  { %v376_v28 = vpack.c.bf16 %v362_v27, %v360_v25 }
  0xf9   :  { %v304_v17 = vpop.f32.mrf.mxu0 }
  0xfe   :  { %v365_v29 = vpop.f32.mrf.mxu1 }
 0x101   :  { %v306_v19 = vpop.f32.mrf.mxu0 }
 0x102   :  { %v373_v20 = vpack.c.bf16 %v306_v19, %v304_v17 }
 0x104   :  { %1797 = vmatmul.msk.bf16.gmra.mxu2 %vm255_vm0, %v373_v20 }
 0x106   :  { %v367_v30 = vpop.f32.mrf.mxu1 }
 0x107   :  { %v377_v31 = vpack.c.bf16 %v367_v30, %v365_v29 }
 0x114   :  { %1798 = vmatmul.msk.bf16.gmra.mxu2 %vm255_vm0, %v374_v23 }
 0x124   :  { %1799 = vmatmul.msk.bf16.gmra.mxu2 %vm255_vm0, %v375_v26 }
 0x134   :  { %1800 = vmatmul.msk.bf16.gmra.mxu2 %vm255_vm0, %v376_v28 }
 0x144   :  { %1801 = vmatmul.msk.bf16.gmra.mxu2 %vm255_vm0, %v377_v31 }
 0x157   :  { %v2341_v32 = vpop.f32.mrf.mxu2 }
 0x158   :  { %v514_v0 = vmul.f32 %v2341_v32, %v2341_v32 }
 0x15f   :  { %v2343_v33 = vpop.f32.mrf.mxu2 }
 0x160   :  { %v488_v61 = vadd.f32 %v2343_v33, %v2341_v32  ;;  %v515_v62 = vmul.f32 %v2343_v33, %v2343_v33 }
 0x162   :  { %v530_v3 = vadd.f32 %v515_v62, %v514_v0  ;;  %v1849_v0 = vld [vmem:[#allocation8 + $0x38] sm:$0xff] }
 0x163   :  { %794 = vmatpush.bf16.msrb.mxu0 %v1849_v0  ;;  %1945 = vmatpush.bf16.msrb.mxu2 %v1849_v0 }
 0x167   :  { %v2345_v34 = vpop.f32.mrf.mxu2 }
 0x168   :  { %v489_v63 = vadd.f32 %v488_v61, %v2345_v34  ;;  %v516_v1 = vmul.f32 %v2345_v34, %v2345_v34 }
 0x16a   :  { %v531_v6 = vadd.f32 %v530_v3, %v516_v1 }
 0x16f   :  { %v2347_v35 = vpop.f32.mrf.mxu2 }
 0x170   :  { %v490_v2 = vadd.f32 %v489_v63, %v2347_v35  ;;  %v517_v4 = vmul.f32 %v2347_v35, %v2347_v35 }
 0x172   :  { %v532_v10 = vadd.f32 %v531_v6, %v517_v4  ;;  %v1848_v6 = vld [vmem:[#allocation8 + $0x30] sm:$0xff] }
 0x173   :  { %795 = vmatpush.bf16.msrb.mxu0 %v1848_v6  ;;  %1946 = vmatpush.bf16.msrb.mxu2 %v1848_v6 }
 0x177   :  { %v2349_v36 = vpop.f32.mrf.mxu2 }
 0x178   :  { %v491_v5 = vadd.f32 %v490_v2, %v2349_v36  ;;  %v518_v7 = vmul.f32 %v2349_v36, %v2349_v36 }
 0x17a   :  { %v533_v14 = vadd.f32 %v532_v10, %v518_v7 }
 0x17f   :  { %v2351_v37 = vpop.f32.mrf.mxu2 }
 0x180   :  { %v492_v9 = vadd.f32 %v491_v5, %v2351_v37  ;;  %v519_v11 = vmul.f32 %v2351_v37, %v2351_v37 }
 0x182   :  { %v534_v20 = vadd.f32 %v533_v14, %v519_v11 }
 0x187   :  { %v2353_v38 = vpop.f32.mrf.mxu2 }
 0x188   :  { %v493_v12 = vadd.f32 %v492_v9, %v2353_v38  ;;  %v520_v15 = vmul.f32 %v2353_v38, %v2353_v38 }
 0x18a   :  { %v535_v25 = vadd.f32 %v534_v20, %v520_v15 }
 0x18f   :  { %v2361_v41 = vpop.f32.mrf.mxu2 }
 0x190   :  { %v494_v16 = vadd.f32 %v493_v12, %v2361_v41  ;;  %v521_v21 = vmul.f32 %v2361_v41, %v2361_v41 }
 0x192   :  { %v495_v27 = vrot.slane %v494_v16, 4  ;;  %v536_v31 = vadd.f32 %v535_v25, %v521_v21 }
 0x194   :  { %v496_v1 = vadd.f32 %v495_v27, %v494_v16  ;;  %v537_v5 = vrot.slane %v536_v31, 4  ;;  %v1847_v16 = vld [vmem:[#allocation8 + $0x28] sm:$0xff] }
 0x195   :  { %796 = vmatpush.bf16.msrb.mxu0 %v1847_v16  ;;  %1947 = vmatpush.bf16.msrb.mxu2 %v1847_v16 }
 0x196   :  { %v497_v11 = vrot.slane %v496_v1, 2  ;;  %v538_v15 = vadd.f32 %v537_v5, %v536_v31 }
 0x197   :  { %v2379_v46 = vpop.f32.mrf.mxu2 }
 0x198   :  { %v522_v17 = vmul.f32 %v2379_v46, %v2379_v46 }
 0x19f   :  { %v2397_v51 = vpop.f32.mrf.mxu2 }
 0x1a0   :  { %v523_v13 = vmul.f32 %v2397_v51, %v2397_v51  ;;  %v501_v18 = vadd.f32 %v2397_v51, %v2379_v46 }
 0x1a2   :  { %v543_v22 = vadd.f32 %v523_v13, %v522_v17 }
 0x1a7   :  { %v2415_v56 = vpop.f32.mrf.mxu2 }
 0x1a8   :  { %v524_v19 = vmul.f32 %v2415_v56, %v2415_v56  ;;  %v502_v23 = vadd.f32 %v501_v18, %v2415_v56 }
 0x1aa   :  { %v544_v28 = vadd.f32 %v543_v22, %v524_v19  ;;  %v498_v19 = vadd.f32 %v497_v11, %v496_v1  ;;  %v539_v22 = vrot.slane %v538_v15, 2 }
 0x1ac   :  { %v540_v31 = vadd.f32 %v539_v22, %v538_v15 }
 0x1ae   :  { %v541_v5 = vrot.slane %v540_v31, 1 }
 0x1af   :  { %v2429_v59 = vpop.f32.mrf.mxu2 }
 0x1b0   :  { %v525_v24 = vmul.f32 %v2429_v59, %v2429_v59  ;;  %v503_v29 = vadd.f32 %v502_v23, %v2429_v59  ;;  %v483_v23 = vld [vmem:[#allocation10] sm:$0x1]  ;;  %v542_v16 = vadd.f32 %v541_v5, %v540_v31 }
 0x1b1   :  { %v562_v27 = vmul.f32 2.0, %v483_v23 }
 0x1b2   :  { %v545_v61 = vadd.f32 %v544_v28, %v525_v24 }
 0x1b3   :  { %v564_v0 = vperm.slane %v562_v27, 0  ;;  %v1968_v27 = vld [vmem:[#allocation10] ss:$0 sm:$0xff] }
 0x1b7   :  { %v2435_v60 = vpop.f32.mrf.mxu2 }
 0x1b8   :  { %v526_v30 = vmul.f32 %v2435_v60, %v2435_v60  ;;  %v504_v62 = vadd.f32 %v503_v29, %v2435_v60 }
 0x1ba   :  { %v546_v2 = vadd.f32 %v545_v61, %v526_v30  ;;  %v499_v30 = vrot.slane %v498_v19, 1  ;;  %v556_v61 = vmul.f32 64.0, %v483_v23 }
 0x1bc   :  { %v500_v1 = vadd.f32 %v499_v30, %v498_v19 }
 0x1bf   :  { %v2456_v8 = vpop.f32.mrf.mxu2 }
 0x1c0   :  { %v527_v63 = vmul.f32 %v2456_v8, %v2456_v8  ;;  %v505_v3 = vadd.f32 %v504_v62, %v2456_v8 }
 0x1c2   :  { %v547_v7 = vadd.f32 %v546_v2, %v527_v63  ;;  %v578_v2 = vmul.f32 %v483_v23, %v483_v23 }
 0x1c7   :  { %v2482_v26 = vpop.f32.mrf.mxu2 }
 0x1c8   :  { %v528_v4 = vmul.f32 %v2482_v26, %v2482_v26  ;;  %v506_v9 = vadd.f32 %v505_v3, %v2482_v26 }
 0x1ca   :  { %v548_v12 = vadd.f32 %v547_v7, %v528_v4  ;;  %v558_v4 = vperm.slane %v556_v61, 0 }
 0x1cf   :  { %v2496_v10 = vpop.f32.mrf.mxu2 }
 0x1d0   :  { %v507_v13 = vadd.f32 %v506_v9, %v2496_v10  ;;  %v529_v14 = vmul.f32 %v2496_v10, %v2496_v10 }
 0x1d2   :  { %v508_v17 = vrot.slane %v507_v13, 4  ;;  %v549_v18 = vadd.f32 %v548_v12, %v529_v14  ;;  %v579_v12 = vmul.f32 64.0, %v578_v2 }
 0x1d4   :  { %v509_v20 = vadd.f32 %v508_v17, %v507_v13  ;;  %v550_v21 = vrot.slane %v549_v18, 4  ;;  %v560_v13 = vadd.f32 %v558_v4, %v500_v1  ;;  %v581_v19 = vperm.slane %v579_v12, 0 }
 0x1d6   :  { %v510_v24 = vrot.slane %v509_v20, 2  ;;  %v551_v25 = vadd.f32 %v550_v21, %v549_v18 }
 0x1d8   :  { %v511_v28 = vadd.f32 %v510_v24, %v509_v20  ;;  %v552_v29 = vrot.slane %v551_v25, 2 }
 0x1da   :  { %v553_v62 = vadd.f32 %v552_v29, %v551_v25  ;;  %v512_v63 = vrot.slane %v511_v28, 1 }
 0x1dc   :  { %v513_v3 = vadd.f32 %v512_v63, %v511_v28  ;;  %v554_v6 = vrot.slane %v553_v62, 1  ;;  %v1969_v28 = vld [vmem:[#allocation10 + $0x1] ss:$0 sm:$0xff] }
 0x1de   :  { %v561_v7 = vadd.f32 %v558_v4, %v513_v3  ;;  %v569_v9 = vsel %vm568_vm1, %v513_v3, %v500_v1  ;;  %v555_v17 = vadd.f32 %v554_v6, %v553_v62  ;;  %v1970_v62 = vld [vmem:[#allocation10 + $0x2] ss:$0 sm:$0xff] }
 0x1df   :  { %v571_v11 = vmul.f32 %v569_v9, %v564_v0 }
 0x1e0   :  { %v587_v14 = vrot.slane %v561_v7, 7 }
 0x1e1   :  { %v573_v15 = vrot.slane %v571_v11, 1  ;;  %v576_v20 = vadd.f32 %v571_v11, %v542_v16 }
 0x1e2   :  { %v588_v18 = vsel %vm568_vm1, %v587_v14, %v560_v13 }
 0x1e3   :  { %606 = vmatmul.f32.vlgmr.msra.gmra.mxu3 %v588_v18  ;;  %v577_v21 = vadd.f32 %v573_v15, %v555_v17  ;;  %v583_v23 = vadd.f32 %v581_v19, %v576_v20 }
 0x1e4   :  { %975 = vmatpush.msra.mxu3 %v2355_v39  ;;  %v1846_v39 = vld [vmem:[#allocation8 + $0x20] sm:$0xff] }
 0x1e5   :  { %v584_v22 = vadd.f32 %v581_v19, %v577_v21  ;;  %797 = vmatpush.bf16.msrb.mxu0 %v1846_v39  ;;  %1948 = vmatpush.bf16.msrb.mxu2 %v1846_v39 }
 0x1e6   :  { %976 = vmatpush.msra.mxu3 %v2359_v40  ;;  %v1845_v40 = vld [vmem:[#allocation8 + $0x18] sm:$0xff] }
 0x1e7   :  { %v612_v24 = vrot.slane %v584_v22, 7 }
 0x1e8   :  { %977 = vmatpush.msra.mxu3 %v2365_v42 }
 0x1e9   :  { %v613_v25 = vsel %vm568_vm1, %v612_v24, %v583_v23  ;;  %798 = vmatpush.bf16.msrb.mxu0 %v1845_v40  ;;  %1949 = vmatpush.bf16.msrb.mxu2 %v1845_v40 }
 0x1ea   :  { %978 = vmatpush.msra.mxu3 %v2369_v43  ;;  %v1844_v43 = vld [vmem:[#allocation8 + $0x10] sm:$0xff] }
 0x1eb   :  { %631 = vmatmul.f32.vlgmr.msrb.gmra.mxu3 %v613_v25 }
 0x1ec   :  { %979 = vmatpush.msra.mxu3 %v2371_v44  ;;  %v1843_v44 = vld [vmem:[#allocation8 + $0x8] sm:$0xff] }
 0x1ed   :  { %799 = vmatpush.bf16.msrb.mxu0 %v1844_v43  ;;  %1950 = vmatpush.bf16.msrb.mxu2 %v1844_v43 }
 0x1ee   :  { %980 = vmatpush.msra.mxu3 %v2377_v45 }
 0x1f0   :  { %981 = vmatpush.msra.mxu3 %v2383_v47 }
 0x1f1   :  { %800 = vmatpush.bf16.msrb.mxu0 %v1843_v44  ;;  %1951 = vmatpush.bf16.msrb.mxu2 %v1843_v44 }
 0x1f2   :  { %982 = vmatpush.msra.mxu3 %v2387_v48 }
 0x1f4   :  { %983 = vmatpush.msra.mxu3 %v2389_v49  ;;  %v1842_v49 = vld [vmem:[#allocation8] sm:$0xff] }
 0x1f5   :  { %801 = vmatpush.bf16.msrb.mxu0 %v1842_v49  ;;  %1952 = vmatpush.bf16.msrb.mxu2 %v1842_v49 }
 0x1f6   :  { %984 = vmatpush.msra.mxu3 %v2395_v50 }
 0x1f8   :  { %985 = vmatpush.msra.mxu3 %v2401_v52 }
 0x1fa   :  { %986 = vmatpush.msra.mxu3 %v2405_v53 }
 0x1fc   :  { %987 = vmatpush.msra.mxu3 %v2407_v54 }
 0x1fe   :  { %988 = vmatpush.msra.mxu3 %v2413_v55 }
 0x200   :  { %989 = vmatpush.msra.mxu3 %v2419_v57 }
 0x202   :  { %990 = vmatpush.msra.mxu3 %v2423_v58 }
 0x266   :  { %v607_v42 = vpop.f32.mrf.mxu3 }
 0x267   :  { %v635_v45 = vmul.f32 %v607_v42, %v607_v42  ;;  %v656_v61 = vsub.f32 %v1968_v27, %v607_v42 }
 0x26e   :  { %v632_v47 = vpop.f32.mrf.mxu3 }
 0x26f   :  { %v636_v48 = vsub.f32 %v632_v47, %v635_v45 }
 0x271   :  { %v637_v50 = vmax.f32 %v636_v48, 0.0 }
 0x273   :  { %v638_v52 = vadd.f32 1e-05, %v637_v50 }
 0x275   :  { %1975 = vrsqrt.f32 %v638_v52  ;;  %vm645_vm3 = vweird.f32 %v638_v52 }
 0x27b   :  { %v1976_v53 = vpop.eup %1975 }
 0x27c   :  { %v640_v54 = vmul.f32 %v1976_v53, %v638_v52  ;;  %vm646_vm2 = vweird.f32 %v1976_v53 }
 0x27d   :  { %vm647_vm4 = vmor %vm645_vm3, %vm646_vm2 }
 0x27e   :  { %v641_v55 = vmul.f32 %v1976_v53, %v640_v54 }
 0x280   :  { %v642_v57 = vmul.f32 0.5, %v641_v55 }
 0x282   :  { %v643_v58 = vsub.f32 1.5, %v642_v57 }
 0x284   :  { %v644_v29 = vmul.f32 %v1976_v53, %v643_v58 }
 0x286   :  { %v648_v30 = vsel %vm647_vm4, %v1976_v53, %v644_v29 }
 0x287   :  { %v652_v31 = vmul.f32 %v1969_v28, %v648_v30 }
 0x289   :  { %v657_v63 = vmul.f32 %v656_v61, %v652_v31  ;;  %v663_v0 = vrot.slane %v652_v31, 1  ;;  %v664_v2 = vperm.slane %v652_v31, 0 }
 0x28b   :  { %v661_v1 = vadd.f32 %v1970_v62, %v657_v63  ;;  %v665_v3 = vperm.slane %v663_v0, 0  ;;  %v668_v6 = vmul.f32 %v664_v2, %v2341_v32  ;;  %v669_v7 = vmul.f32 %v664_v2, %v2343_v33 }
 0x28c   :  { %v670_v23 = vmul.f32 %v664_v2, %v2345_v34  ;;  %v671_v24 = vmul.f32 %v664_v2, %v2347_v35  ;;  %v672_v35 = vmul.f32 %v664_v2, %v2349_v36  ;;  %v674_v58 = vmul.f32 %v664_v2, %v2353_v38 }
 0x28d   :  { %v685_v4 = vrot.slane %v661_v1, 1  ;;  %v686_v5 = vperm.slane %v661_v1, 0  ;;  %v680_v9 = vmul.f32 %v665_v3, %v2435_v60  ;;  %v681_v14 = vmul.f32 %v665_v3, %v2456_v8 }
 0x28e   :  { %v678_v32 = vmul.f32 %v665_v3, %v2415_v56  ;;  %v679_v33 = vmul.f32 %v665_v3, %v2429_v59  ;;  %v682_v25 = vmul.f32 %v665_v3, %v2482_v26  ;;  %v683_v43 = vmul.f32 %v665_v3, %v2496_v10 }
 0x28f   :  { %v687_v11 = vperm.slane %v685_v4, 0  ;;  %v690_v12 = vadd.f32 %v686_v5, %v668_v6  ;;  %v691_v13 = vadd.f32 %v686_v5, %v669_v7  ;;  %v692_v40 = vadd.f32 %v686_v5, %v670_v23 }
 0x290   :  { %v693_v42 = vadd.f32 %v686_v5, %v671_v24  ;;  %v673_v26 = vmul.f32 %v664_v2, %v2351_v37  ;;  %v694_v53 = vadd.f32 %v686_v5, %v672_v35  ;;  %v675_v27 = vmul.f32 %v664_v2, %v2361_v41 }
 0x291   :  { %v706_v16 = vmax.f32 %v690_v12, 0.0  ;;  %v707_v17 = vmax.f32 %v691_v13, 0.0  ;;  %v702_v15 = vadd.f32 %v687_v11, %v680_v9  ;;  %v703_v18 = vadd.f32 %v687_v11, %v681_v14 }
 0x292   :  { %v700_v60 = vadd.f32 %v687_v11, %v678_v32  ;;  %v701_v8 = vadd.f32 %v687_v11, %v679_v33  ;;  %v704_v45 = vadd.f32 %v687_v11, %v682_v25  ;;  %v705_v47 = vadd.f32 %v687_v11, %v683_v43 }
 0x293   :  { %v722_v20 = vpack.c.bf16 %v707_v17, %v706_v16  ;;  %v718_v21 = vmax.f32 %v702_v15, 0.0  ;;  %v719_v19 = vmax.f32 %v703_v18, 0.0  ;;  %v708_v48 = vmax.f32 %v692_v40, 0.0 }
 0x294   :  { %v716_v39 = vmax.f32 %v700_v60, 0.0  ;;  %v717_v44 = vmax.f32 %v701_v8, 0.0  ;;  %v709_v49 = vmax.f32 %v693_v42, 0.0  ;;  %v720_v59 = vmax.f32 %v704_v45, 0.0 }
 0x295   :  { %802 = vmatmul.bf16.vlgmr.msrb.gmra.mxu0 %v722_v20  ;;  %v728_v22 = vpack.c.bf16 %v719_v19, %v718_v21  ;;  %v721_v50 = vmax.f32 %v705_v47, 0.0  ;;  %v695_v54 = vadd.f32 %v686_v5, %v673_v26  ;;  %v710_v55 = vmax.f32 %v694_v53, 0.0 }
 0x296   :  { %v727_v56 = vpack.c.bf16 %v717_v44, %v716_v39  ;;  %v723_v52 = vpack.c.bf16 %v709_v49, %v708_v48  ;;  %v696_v28 = vadd.f32 %v686_v5, %v674_v58  ;;  %v697_v29 = vadd.f32 %v686_v5, %v675_v27 }
 0x297   :  { %832 = vmatmul.bf16.vlgmr.msrb.gmra.mxu2 %v728_v22  ;;  %v729_v34 = vpack.c.bf16 %v721_v50, %v720_v59  ;;  %v711_v10 = vmax.f32 %v695_v54, 0.0  ;;  %v676_v36 = vmul.f32 %v665_v3, %v2379_v46  ;;  %v677_v37 = vmul.f32 %v665_v3, %v2397_v51 }
 0x298   :  { %v712_v30 = vmax.f32 %v696_v28, 0.0  ;;  %v713_v61 = vmax.f32 %v697_v29, 0.0 }
 0x299   :  { %v724_v57 = vpack.c.bf16 %v711_v10, %v710_v55  ;;  %v698_v62 = vadd.f32 %v687_v11, %v676_v36  ;;  %v699_v63 = vadd.f32 %v687_v11, %v677_v37 }
 0x29a   :  { %v725_v31 = vpack.c.bf16 %v713_v61, %v712_v30 }
 0x29b   :  { %v714_v0 = vmax.f32 %v698_v62, 0.0  ;;  %v715_v1 = vmax.f32 %v699_v63, 0.0 }
 0x29d   :  { %v726_v4 = vpack.c.bf16 %v715_v1, %v714_v0 }
 0x2a5   :  { %807 = vmatmul.bf16.gmra.mxu0 %v723_v52 }
 0x2a7   :  { %837 = vmatmul.bf16.gmra.mxu2 %v729_v34 }
 0x2b5   :  { %812 = vmatmul.bf16.gmra.mxu0 %v724_v57 }
 0x2c5   :  { %817 = vmatmul.bf16.gmra.mxu0 %v725_v31 }
 0x2d5   :  { %822 = vmatmul.bf16.gmra.mxu0 %v726_v4 }
 0x2e5   :  { %827 = vmatmul.bf16.gmra.mxu0 %v727_v56 }
 0x312   :  { %v2536_v38 = vpop.f32.mrf.mxu0 }
 0x313   :  { %v875_v17 = vmul.f32 %v2536_v38, %v2536_v38 }
 0x31a   :  { %v2538_v41 = vpop.f32.mrf.mxu0  ;;  %v2552_v7 = vpop.f32.mrf.mxu2 }
 0x31b   :  { %v849_v12 = vadd.f32 %v2538_v41, %v2536_v38  ;;  %v876_v13 = vmul.f32 %v2538_v41, %v2538_v41  ;;  %v887_v55 = vmul.f32 %v2552_v7, %v2552_v7 }
 0x31d   :  { %v891_v20 = vadd.f32 %v876_v13, %v875_v17 }
 0x322   :  { %v2540_v2 = vpop.f32.mrf.mxu0  ;;  %v2562_v14 = vpop.f32.mrf.mxu2 }
 0x323   :  { %v850_v16 = vadd.f32 %v849_v12, %v2540_v2  ;;  %v877_v15 = vmul.f32 %v2540_v2, %v2540_v2  ;;  %v888_v58 = vmul.f32 %v2562_v14, %v2562_v14 }
 0x325   :  { %v892_v22 = vadd.f32 %v891_v20, %v877_v15  ;;  %v844_v20 = vld [vmem:[#allocation10 + $0x3] sm:$0x1] }
 0x32a   :  { %v2542_v5 = vpop.f32.mrf.mxu0  ;;  %v2583_v39 = vpop.f32.mrf.mxu2 }
 0x32b   :  { %v851_v18 = vadd.f32 %v850_v16, %v2542_v5  ;;  %v878_v21 = vmul.f32 %v2542_v5, %v2542_v5  ;;  %v889_v31 = vmul.f32 %v2583_v39, %v2583_v39 }
 0x32d   :  { %v893_v23 = vadd.f32 %v892_v22, %v878_v21  ;;  %v923_v22 = vmul.f32 2.0, %v844_v20 }
 0x332   :  { %v2544_v6 = vpop.f32.mrf.mxu0  ;;  %v2608_v30 = vpop.f32.mrf.mxu2 }
 0x333   :  { %v852_v19 = vadd.f32 %v851_v18, %v2544_v6  ;;  %v879_v32 = vmul.f32 %v2544_v6, %v2544_v6  ;;  %v890_v62 = vmul.f32 %v2608_v30, %v2608_v30 }
 0x335   :  { %v894_v40 = vadd.f32 %v893_v23, %v879_v32 }
 0x33a   :  { %v2546_v46 = vpop.f32.mrf.mxu0 }
 0x33b   :  { %v853_v60 = vadd.f32 %v852_v19, %v2546_v46  ;;  %v880_v24 = vmul.f32 %v2546_v46, %v2546_v46 }
 0x33d   :  { %v895_v56 = vadd.f32 %v894_v40, %v880_v24  ;;  %v917_v24 = vmul.f32 64.0, %v844_v20 }
 0x342   :  { %v2548_v51 = vpop.f32.mrf.mxu0 }
 0x343   :  { %v854_v8 = vadd.f32 %v853_v60, %v2548_v51  ;;  %v881_v42 = vmul.f32 %v2548_v51, %v2548_v51 }
 0x345   :  { %v896_v50 = vadd.f32 %v895_v56, %v881_v42  ;;  %v925_v42 = vperm.slane %v923_v22, 0  ;;  %v1558_v22 = vld [vmem:[#allocation14 + $0x50] sm:$0xff] }
 0x34a   :  { %v2550_v3 = vpop.f32.mrf.mxu0 }
 0x34b   :  { %v855_v43 = vadd.f32 %v854_v8, %v2550_v3  ;;  %v882_v48 = vmul.f32 %v2550_v3, %v2550_v3 }
 0x34d   :  { %v856_v34 = vrot.slane %v855_v43, 4  ;;  %v897_v54 = vadd.f32 %v896_v50, %v882_v48 }
 0x34f   :  { %v857_v27 = vadd.f32 %v856_v34, %v855_v43  ;;  %v898_v61 = vrot.slane %v897_v54, 4  ;;  %v938_v43 = vmul.f32 %v844_v20, %v844_v20 }
 0x351   :  { %v858_v63 = vrot.slane %v857_v27, 2  ;;  %v899_v4 = vadd.f32 %v898_v61, %v897_v54  ;;  %v939_v34 = vmul.f32 64.0, %v938_v43  ;;  %v1592_v43 = vld [vmem:[#allocation14 + $0x160] sm:$0xff] }
 0x352   :  { %v2554_v9 = vpop.f32.mrf.mxu0 }
 0x353   :  { %v883_v44 = vmul.f32 %v2554_v9, %v2554_v9  ;;  %v859_v16 = vadd.f32 %v858_v63, %v857_v27  ;;  %v900_v18 = vrot.slane %v899_v4, 2  ;;  %v941_v27 = vperm.slane %v939_v34, 0  ;;  %v1579_v63 = vld [vmem:[#allocation14 + $0xf8] sm:$0xff]  ;;  %v1590_v34 = vld [vmem:[#allocation14 + $0x150] sm:$0xff] }
 0x354   :  { %1652 = vmatpush.msrb.mxu3 %v1579_v63  ;;  %v1566_v63 = vld [vmem:[#allocation14 + $0x90] sm:$0xff] }
 0x355   :  { %v860_v32 = vrot.slane %v859_v16, 1  ;;  %v901_v8 = vadd.f32 %v900_v18, %v899_v4  ;;  %v1562_v4 = vld [vmem:[#allocation14 + $0x70] sm:$0xff]  ;;  %v1576_v18 = vld [vmem:[#allocation14 + $0xe0] sm:$0xff] }
 0x357   :  { %v902_v56 = vrot.slane %v901_v8, 1 }
 0x35a   :  { %v2556_v11 = vpop.f32.mrf.mxu0 }
 0x35b   :  { %v884_v25 = vmul.f32 %v2556_v11, %v2556_v11  ;;  %v862_v45 = vadd.f32 %v2556_v11, %v2554_v9 }
 0x35d   :  { %v904_v49 = vadd.f32 %v884_v25, %v883_v44  ;;  %v861_v44 = vadd.f32 %v860_v32, %v859_v16  ;;  %v1577_v16 = vld [vmem:[#allocation14 + $0xe8] sm:$0xff]  ;;  %v1574_v32 = vld [vmem:[#allocation14 + $0xd0] sm:$0xff] }
 0x362   :  { %v2575_v33 = vpop.f32.mrf.mxu0 }
 0x363   :  { %v885_v47 = vmul.f32 %v2575_v33, %v2575_v33  ;;  %v863_v59 = vadd.f32 %v862_v45, %v2575_v33 }
 0x365   :  { %v905_v35 = vadd.f32 %v904_v49, %v885_v47  ;;  %v919_v47 = vperm.slane %v917_v24, 0  ;;  %v1573_v24 = vld [vmem:[#allocation14 + $0xc8] sm:$0xff] }
 0x36a   :  { %v2597_v52 = vpop.f32.mrf.mxu0 }
 0x36b   :  { %v864_v26 = vadd.f32 %v863_v59, %v2597_v52  ;;  %v886_v53 = vmul.f32 %v2597_v52, %v2597_v52 }
 0x36d   :  { %v865_v10 = vadd.f32 %v864_v26, %v2552_v7  ;;  %v906_v57 = vadd.f32 %v905_v35, %v886_v53  ;;  %v921_v35 = vadd.f32 %v919_v47, %v861_v44  ;;  %v903_v53 = vadd.f32 %v902_v56, %v901_v8  ;;  %v1594_v8 = vld [vmem:[#allocation14 + $0x170] sm:$0xff] }
 0x36f   :  { %v866_v28 = vadd.f32 %v865_v10, %v2562_v14  ;;  %v907_v29 = vadd.f32 %v906_v57, %v887_v55 }
 0x371   :  { %v867_v36 = vadd.f32 %v866_v28, %v2583_v39  ;;  %v908_v37 = vadd.f32 %v907_v29, %v888_v58 }
 0x373   :  { %v868_v0 = vadd.f32 %v867_v36, %v2608_v30  ;;  %v909_v1 = vadd.f32 %v908_v37, %v889_v31 }
 0x375   :  { %v869_v12 = vrot.slane %v868_v0, 4  ;;  %v910_v13 = vadd.f32 %v909_v1, %v890_v62  ;;  %v1563_v62 = vld [vmem:[#allocation14 + $0x78] sm:$0xff] }
 0x376   :  { %1632 = vmatpush.msra.mxu1 %v1563_v62  ;;  %v1550_v62 = vld [vmem:[#allocation14 + $0x10] sm:$0xff] }
 0x377   :  { %v870_v17 = vadd.f32 %v869_v12, %v868_v0  ;;  %v911_v15 = vrot.slane %v910_v13, 4  ;;  %v1578_v12 = vld [vmem:[#allocation14 + $0xf0] sm:$0xff] }
 0x378   :  { %1633 = vmatpush.msra.mxu1 %v1562_v4  ;;  %1653 = vmatpush.msrb.mxu3 %v1578_v12  ;;  %v1549_v4 = vld [vmem:[#allocation14 + $0x8] sm:$0xff]  ;;  %v1586_v12 = vld [vmem:[#allocation14 + $0x130] sm:$0xff] }
 0x379   :  { %v912_v21 = vadd.f32 %v911_v15, %v910_v13  ;;  %v871_v19 = vrot.slane %v870_v17, 2  ;;  %v1561_v13 = vld [vmem:[#allocation14 + $0x68] sm:$0xff]  ;;  %v1560_v15 = vld [vmem:[#allocation14 + $0x60] sm:$0xff] }
 0x37a   :  { %1634 = vmatpush.msra.mxu1 %v1561_v13  ;;  %1654 = vmatpush.msrb.mxu3 %v1577_v16 }
 0x37b   :  { %v913_v60 = vrot.slane %v912_v21, 2  ;;  %v872_v23 = vadd.f32 %v871_v19, %v870_v17  ;;  %v1575_v19 = vld [vmem:[#allocation14 + $0xd8] sm:$0xff] }
 0x37c   :  { %1635 = vmatpush.msra.mxu1 %v1560_v15  ;;  %1655 = vmatpush.msrb.mxu3 %v1576_v18  ;;  %v2629_v15 = vld [vmem:[#allocation13] sm:$0xff]   ;;  %v2631_v18 = vld [vmem:[#allocation13 + $0x8] sm:$0xff]  }
 0x37d   :  { %v873_v25 = vrot.slane %v872_v23, 1  ;;  %v914_v40 = vadd.f32 %v913_v60, %v912_v21  ;;  %v1559_v21 = vld [vmem:[#allocation14 + $0x58] sm:$0xff] }
 0x37e   :  { %1636 = vmatpush.msra.mxu1 %v1559_v21  ;;  %1656 = vmatpush.msrb.mxu3 %v1575_v19  ;;  %v1595_v60 = vld [vmem:[#allocation14 + $0x178] sm:$0xff] }
 0x37f   :  { %v874_v45 = vadd.f32 %v873_v25, %v872_v23  ;;  %v915_v48 = vrot.slane %v914_v40, 1  ;;  %v1557_v23 = vld [vmem:[#allocation14 + $0x48] sm:$0xff]  ;;  %1672 = vmatpush.msra.mxu2 %v1595_v60  ;;  %v1564_v60 = vld [vmem:[#allocation14 + $0x80] sm:$0xff] }
 0x380   :  { %1637 = vmatpush.msra.mxu1 %v1558_v22  ;;  %1657 = vmatpush.msrb.mxu3 %v1574_v32  ;;  %v1593_v25 = vld [vmem:[#allocation14 + $0x168] sm:$0xff]  ;;  %v1548_v32 = vld [vmem:[#allocation14] sm:$0xff] }
 0x381   :  { %v922_v49 = vadd.f32 %v919_v47, %v874_v45  ;;  %v929_v59 = vsel %vm568_vm1, %v874_v45, %v861_v44  ;;  %v916_v54 = vadd.f32 %v915_v48, %v914_v40  ;;  %v1556_v40 = vld [vmem:[#allocation14 + $0x40] sm:$0xff]  ;;  %1673 = vmatpush.msra.mxu2 %v1594_v8  ;;  %v1555_v45 = vld [vmem:[#allocation14 + $0x38] sm:$0xff]  ;;  %v1852_v8 = vunpack.c.l.bf16 %v2629_v15 }
 0x382   :  { %v931_v50 = vmul.f32 %v929_v59, %v925_v42  ;;  %v1572_v42 = vld [vmem:[#allocation14 + $0xc0] sm:$0xff]  ;;  %1638 = vmatpush.msra.mxu1 %v1557_v23  ;;  %1658 = vmatpush.msrb.mxu3 %v1573_v24  ;;  %v1571_v47 = vld [vmem:[#allocation14 + $0xb8] sm:$0xff]  ;;  %v1570_v59 = vld [vmem:[#allocation14 + $0xb0] sm:$0xff] }
 0x383   :  { %v947_v26 = vrot.slane %v922_v49, 7  ;;  %1674 = vmatpush.msra.mxu2 %v1593_v25  ;;  %v1591_v48 = vld [vmem:[#allocation14 + $0x158] sm:$0xff]  ;;  %v1554_v49 = vld [vmem:[#allocation14 + $0x30] sm:$0xff]  ;;  %v1853_v25 = vunpack.c.h.bf16 %v2629_v15 }
 0x384   :  { %v933_v55 = vrot.slane %v931_v50, 1  ;;  %v936_v57 = vadd.f32 %v931_v50, %v903_v53  ;;  %1639 = vmatpush.msra.mxu1 %v1556_v40  ;;  %1659 = vmatpush.msrb.mxu3 %v1572_v42  ;;  %v2633_v23 = vld [vmem:[#allocation13 + $0x10] sm:$0xff]   ;;  %v1627_v24 = vld [vmem:[#allocation14 + $0x278] sm:$0xff]  ;;  %v1856_v40 = vunpack.c.l.bf16 %v2631_v18  ;;  %v1857_v42 = vunpack.c.h.bf16 %v2631_v18 }
 0x385   :  { %v948_v10 = vsel %vm568_vm1, %v947_v26, %v921_v35  ;;  %1675 = vmatpush.msra.mxu2 %v1592_v43  ;;  %v1553_v35 = vld [vmem:[#allocation14 + $0x28] sm:$0xff] }
 0x386   :  { %966 = vmatmul.f32.vlgmr.msrb.gmra.mxu1 %v948_v10  ;;  %v937_v58 = vadd.f32 %v933_v55, %v916_v54  ;;  %v943_v29 = vadd.f32 %v941_v27, %v936_v57  ;;  %1660 = vmatpush.msrb.mxu3 %v1571_v47  ;;  %v1569_v26 = vld [vmem:[#allocation14 + $0xa8] sm:$0xff]  ;;  %v1552_v55 = vld [vmem:[#allocation14 + $0x20] sm:$0xff]  ;;  %v1971_v57 = vld [vmem:[#allocation10 + $0x3] ss:$0 sm:$0xff] }
 0x387   :  { %1640 = vmatpush.msra.mxu1 %v1555_v45  ;;  %1676 = vmatpush.msra.mxu2 %v1591_v48  ;;  %v1589_v54 = vld [vmem:[#allocation14 + $0x148] sm:$0xff]  ;;  %v1568_v10 = vld [vmem:[#allocation14 + $0xa0] sm:$0xff]  ;;  %v1610_v48 = vld [vmem:[#allocation14 + $0x1f0] sm:$0xff] }
 0x388   :  { %v944_v28 = vadd.f32 %v941_v27, %v937_v58  ;;  %1661 = vmatpush.msrb.mxu3 %v1570_v59  ;;  %v1588_v27 = vld [vmem:[#allocation14 + $0x140] sm:$0xff] }
 0x389   :  { %1641 = vmatpush.msra.mxu1 %v1554_v49  ;;  %1677 = vmatpush.msra.mxu2 %v1590_v34  ;;  %v1626_v49 = vld [vmem:[#allocation14 + $0x270] sm:$0xff] }
 0x38a   :  { %v972_v61 = vrot.slane %v944_v28, 7  ;;  %1662 = vmatpush.msrb.mxu3 %v1569_v26  ;;  %v1972_v28 = vld [vmem:[#allocation10 + $0x4] ss:$0 sm:$0xff] }
 0x38b   :  { %1642 = vmatpush.msra.mxu1 %v1553_v35  ;;  %1678 = vmatpush.msra.mxu2 %v1589_v54  ;;  %v1860_v35 = vunpack.c.l.bf16 %v2633_v23  ;;  %v1583_v54 = vld [vmem:[#allocation14 + $0x118] sm:$0xff] }
 0x38c   :  { %v973_v31 = vsel %vm568_vm1, %v972_v61, %v943_v29  ;;  %v1551_v29 = vld [vmem:[#allocation14 + $0x18] sm:$0xff]  ;;  %1663 = vmatpush.msrb.mxu3 %v1568_v10  ;;  %v1625_v10 = vld [vmem:[#allocation14 + $0x268] sm:$0xff] }
 0x38d   :  { %991 = vmatmul.f32.vlgmr.msra.gmra.mxu3 %v973_v31  ;;  %v1567_v61 = vld [vmem:[#allocation14 + $0x98] sm:$0xff]  ;;  %1643 = vmatpush.msra.mxu1 %v1552_v55  ;;  %v1609_v55 = vld [vmem:[#allocation14 + $0x1e8] sm:$0xff] }
 0x38e   :  { %1679 = vmatpush.msra.mxu2 %v1588_v27  ;;  %1664 = vmatpush.msrb.mxu3 %v1567_v61  ;;  %v1624_v61 = vld [vmem:[#allocation14 + $0x260] sm:$0xff] }
 0x38f   :  { %1644 = vmatpush.msra.mxu1 %v1551_v29  ;;  %v1608_v29 = vld [vmem:[#allocation14 + $0x1e0] sm:$0xff] }
 0x390   :  { %1665 = vmatpush.msrb.mxu3 %v1566_v63 }
 0x391   :  { %1645 = vmatpush.msra.mxu1 %v1550_v62 }
 0x393   :  { %1646 = vmatpush.msra.mxu1 %v1549_v4 }
 0x395   :  { %1647 = vmatpush.msra.mxu1 %v1548_v32 }
 0x403   :  { %v2619_v36 = vpop.f32.mrf.mxu1 }
 0x404   :  { %v995_v37 = vmul.f32 %v2619_v36, %v2619_v36  ;;  %v1016_v13 = vsub.f32 %v1971_v57, %v2619_v36  ;;  %v1611_v36 = vld [vmem:[#allocation14 + $0x1f8] sm:$0xff] }
 0x405   :  { %1692 = vmatpush.msrb.mxu1 %v1611_v36 }
 0x407   :  { %1693 = vmatpush.msrb.mxu1 %v1610_v48 }
 0x409   :  { %1694 = vmatpush.msrb.mxu1 %v1609_v55 }
 0x40b   :  { %1695 = vmatpush.msrb.mxu1 %v1608_v29 }
 0x410   :  { %v992_v0 = vpop.f32.mrf.mxu3 }
 0x411   :  { %v996_v1 = vsub.f32 %v992_v0, %v995_v37  ;;  %v1587_v37 = vld [vmem:[#allocation14 + $0x138] sm:$0xff] }
 0x412   :  { %1680 = vmatpush.msra.mxu2 %v1587_v37  ;;  %v1581_v37 = vld [vmem:[#allocation14 + $0x108] sm:$0xff] }
 0x413   :  { %v997_v17 = vmax.f32 %v996_v1, 0.0  ;;  %v1973_v1 = vld [vmem:[#allocation10 + $0x5] ss:$0 sm:$0xff] }
 0x414   :  { %1681 = vmatpush.msra.mxu2 %v1586_v12 }
 0x415   :  { %v2623_v20 = vadd.f32 1e-05, %v997_v17  ;;  %v1565_v17 = vld [vmem:[#allocation14 + $0x88] sm:$0xff] }
 0x416   :  { %1666 = vmatpush.msrb.mxu3 %v1565_v17 }
 0x417   :  { %1977 = vrsqrt.f32 %v2623_v20  ;;  %vm1005_vm6 = vweird.f32 %v2623_v20 }
 0x418   :  { %1667 = vmatpush.msrb.mxu3 %v1564_v60 }
 0x41a   :  { %1712 = vmatpush.msra.mxu3 %v1627_v24 }
 0x41c   :  { %1713 = vmatpush.msra.mxu3 %v1626_v49 }
 0x41d   :  { %v1978_v44 = vpop.eup %1977 }
 0x41e   :  { %v1000_v56 = vmul.f32 %v1978_v44, %v2623_v20  ;;  %vm1006_vm5 = vweird.f32 %v1978_v44  ;;  %v1585_v20 = vld [vmem:[#allocation14 + $0x128] sm:$0xff]  ;;  %1714 = vmatpush.msra.mxu3 %v1625_v10 }
 0x41f   :  { %vm1007_vm7 = vmor %vm1005_vm6, %vm1006_vm5  ;;  %1682 = vmatpush.msra.mxu2 %v1585_v20 }
 0x420   :  { %v1001_v50 = vmul.f32 %v1978_v44, %v1000_v56  ;;  %v1584_v56 = vld [vmem:[#allocation14 + $0x120] sm:$0xff]  ;;  %1715 = vmatpush.msra.mxu3 %v1624_v61 }
 0x421   :  { %1683 = vmatpush.msra.mxu2 %v1584_v56  ;;  %v1621_v56 = vld [vmem:[#allocation14 + $0x248] sm:$0xff] }
 0x422   :  { %v1002_v53 = vmul.f32 0.5, %v1001_v50 }
 0x423   :  { %1684 = vmatpush.msra.mxu2 %v1583_v54  ;;  %v1620_v54 = vld [vmem:[#allocation14 + $0x240] sm:$0xff] }
 0x424   :  { %v1003_v58 = vsub.f32 1.5, %v1002_v53 }
 0x426   :  { %v1004_v31 = vmul.f32 %v1978_v44, %v1003_v58 }
 0x428   :  { %v1008_v0 = vsel %vm1007_vm7, %v1978_v44, %v1004_v31 }
 0x429   :  { %v1012_v16 = vmul.f32 %v1972_v28, %v1008_v0  ;;  %v1623_v0 = vld [vmem:[#allocation14 + $0x258] sm:$0xff] }
 0x42a   :  { %1716 = vmatpush.msra.mxu3 %v1623_v0 }
 0x42b   :  { %v1017_v21 = vmul.f32 %v1016_v13, %v1012_v16  ;;  %v1023_v19 = vrot.slane %v1012_v16, 1  ;;  %v1024_v22 = vperm.slane %v1012_v16, 0 }
 0x42d   :  { %v1021_v43 = vadd.f32 %v1973_v1, %v1017_v21  ;;  %v1025_v44 = vperm.slane %v1023_v19, 0  ;;  %v1028_v45 = vmul.f32 %v1024_v22, %v2536_v38  ;;  %v1029_v47 = vmul.f32 %v1024_v22, %v2538_v41  ;;  %v1606_v21 = vld [vmem:[#allocation14 + $0x1d0] sm:$0xff] }
 0x42e   :  { %v1030_v59 = vmul.f32 %v1024_v22, %v2540_v2  ;;  %v1031_v50 = vmul.f32 %v1024_v22, %v2542_v5  ;;  %v1032_v34 = vmul.f32 %v1024_v22, %v2544_v6  ;;  %v1033_v2 = vmul.f32 %v1024_v22, %v2546_v46  ;;  %v1622_v19 = vld [vmem:[#allocation14 + $0x250] sm:$0xff] }
 0x42f   :  { %v1036_v26 = vmul.f32 %v1025_v44, %v2554_v9  ;;  %v1037_v38 = vmul.f32 %v1025_v44, %v2556_v11  ;;  %v1045_v53 = vrot.slane %v1021_v43, 1  ;;  %v1046_v41 = vperm.slane %v1021_v43, 0  ;;  %v1582_v9 = vld [vmem:[#allocation14 + $0x110] sm:$0xff]  ;;  %1717 = vmatpush.msra.mxu3 %v1622_v19 }
 0x430   :  { %v1034_v5 = vmul.f32 %v1024_v22, %v2548_v51  ;;  %v1035_v6 = vmul.f32 %v1024_v22, %v2550_v3  ;;  %v1038_v57 = vmul.f32 %v1025_v44, %v2575_v33  ;;  %v1039_v11 = vmul.f32 %v1025_v44, %v2597_v52  ;;  %v2656_v33 = vld [vmem:[#allocation13 + $0x18] sm:$0xff]   ;;  %1685 = vmatpush.msra.mxu2 %v1582_v9 }
 0x431   :  { %v1047_v58 = vperm.slane %v1045_v53, 0  ;;  %v1040_v27 = vmul.f32 %v1025_v44, %v2552_v7  ;;  %v1041_v28 = vmul.f32 %v1025_v44, %v2562_v14  ;;  %v1042_v46 = vmul.f32 %v1025_v44, %v2583_v39  ;;  %v1607_v14 = vld [vmem:[#allocation14 + $0x1d8] sm:$0xff]  ;;  %1718 = vmatpush.msra.mxu3 %v1621_v56 }
 0x432   :  { %v1043_v51 = vmul.f32 %v1025_v44, %v2608_v30  ;;  %v1050_v3 = vadd.f32 %v1046_v41, %v1028_v45  ;;  %v1051_v31 = vadd.f32 %v1046_v41, %v1029_v47  ;;  %v1052_v62 = vadd.f32 %v1046_v41, %v1030_v59  ;;  %v1580_v30 = vld [vmem:[#allocation14 + $0x100] sm:$0xff]  ;;  %1686 = vmatpush.msra.mxu2 %v1581_v37  ;;  %v1605_v47 = vld [vmem:[#allocation14 + $0x1c8] sm:$0xff] }
 0x433   :  { %v1053_v52 = vadd.f32 %v1046_v41, %v1031_v50  ;;  %v1054_v63 = vadd.f32 %v1046_v41, %v1032_v34  ;;  %v1861_v7 = vunpack.c.h.bf16 %v2633_v23  ;;  %v1055_v1 = vadd.f32 %v1046_v41, %v1033_v2  ;;  %1696 = vmatpush.msrb.mxu1 %v1607_v14  ;;  %1719 = vmatpush.msra.mxu3 %v1620_v54 }
 0x434   :  { %v1056_v4 = vadd.f32 %v1046_v41, %v1034_v5  ;;  %v1057_v39 = vadd.f32 %v1046_v41, %v1035_v6  ;;  %v1058_v12 = vadd.f32 %v1047_v58, %v1036_v26  ;;  %v1059_v13 = vadd.f32 %v1047_v58, %v1037_v38  ;;  %1687 = vmatpush.msra.mxu2 %v1580_v30  ;;  %v1604_v41 = vld [vmem:[#allocation14 + $0x1c0] sm:$0xff] }
 0x435   :  { %v1060_v16 = vadd.f32 %v1047_v58, %v1038_v57  ;;  %v1061_v17 = vadd.f32 %v1047_v58, %v1039_v11  ;;  %v1864_v20 = vunpack.c.l.bf16 %v2656_v33  ;;  %v1062_v22 = vadd.f32 %v1047_v58, %v1040_v27  ;;  %1697 = vmatpush.msrb.mxu1 %v1606_v21  ;;  %v1603_v11 = vld [vmem:[#allocation14 + $0x1b8] sm:$0xff] }
 0x436   :  { %v1063_v32 = vadd.f32 %v1047_v58, %v1041_v28  ;;  %v1064_v60 = vadd.f32 %v1047_v58, %v1042_v46  ;;  %v1066_v36 = vmax.f32 %v1050_v3, 0.0  ;;  %v1065_v24 = vadd.f32 %v1047_v58, %v1043_v51  ;;  %v1619_v27 = vld [vmem:[#allocation14 + $0x238] sm:$0xff] }
 0x437   :  { %v1067_v43 = vmax.f32 %v1051_v31, 0.0  ;;  %v1068_v44 = vmax.f32 %v1052_v62, 0.0  ;;  %v1069_v45 = vmax.f32 %v1053_v52, 0.0  ;;  %v1070_v48 = vmax.f32 %v1054_v63, 0.0  ;;  %1698 = vmatpush.msrb.mxu1 %v1605_v47  ;;  %v1602_v62 = vld [vmem:[#allocation14 + $0x1b0] sm:$0xff]  ;;  %1720 = vmatpush.msra.mxu3 %v1619_v27 }
 0x438   :  { %v1071_v49 = vmax.f32 %v1055_v1, 0.0  ;;  %v1072_v59 = vmax.f32 %v1056_v4, 0.0  ;;  %v1073_v50 = vmax.f32 %v1057_v39, 0.0  ;;  %v1074_v34 = vmax.f32 %v1058_v12, 0.0  ;;  %v1618_v52 = vld [vmem:[#allocation14 + $0x230] sm:$0xff] }
 0x439   :  { %v1075_v26 = vmax.f32 %v1059_v13, 0.0  ;;  %v1076_v38 = vmax.f32 %v1060_v16, 0.0  ;;  %v1077_v53 = vmax.f32 %v1061_v17, 0.0  ;;  %v1078_v55 = vmax.f32 %v1062_v22, 0.0  ;;  %1699 = vmatpush.msrb.mxu1 %v1604_v41  ;;  %v1601_v13 = vld [vmem:[#allocation14 + $0x1a8] sm:$0xff]  ;;  %1721 = vmatpush.msra.mxu3 %v1618_v52  ;;  %v1934_v27 = vld [vmem:[#allocation13 + $0x30] sm:$0xff]  }
 0x43a   :  { %v1079_v10 = vmax.f32 %v1063_v32, 0.0  ;;  %v1080_v2 = vmax.f32 %v1064_v60, 0.0  ;;  %v1082_v5 = vpack.c.bf16 %v1066_v36, %v1066_v36  ;;  %v1081_v6 = vmax.f32 %v1065_v24, 0.0  ;;  %v1617_v16 = vld [vmem:[#allocation14 + $0x228] sm:$0xff] }
 0x43b   :  { %v1083_v57 = vpack.c.bf16 %v1067_v43, %v1067_v43  ;;  %v1084_v58 = vpack.c.bf16 %v1068_v44, %v1068_v44  ;;  %v1085_v9 = vpack.c.bf16 %v1069_v45, %v1069_v45  ;;  %v1086_v28 = vpack.c.bf16 %v1070_v48, %v1070_v48  ;;  %1700 = vmatpush.msrb.mxu1 %v1603_v11  ;;  %v1600_v43 = vld [vmem:[#allocation14 + $0x1a0] sm:$0xff] }
 0x43c   :  { %v1087_v29 = vpack.c.bf16 %v1071_v49, %v1071_v49  ;;  %v1088_v61 = vpack.c.bf16 %v1072_v59, %v1072_v59  ;;  %v1089_v46 = vpack.c.bf16 %v1073_v50, %v1073_v50  ;;  %v1090_v51 = vpack.c.bf16 %v1074_v34, %v1074_v34  ;;  %v1616_v44 = vld [vmem:[#allocation14 + $0x220] sm:$0xff]  ;;  %1722 = vmatpush.msra.mxu3 %v1617_v16 }
 0x43d   :  { %v1091_v3 = vpack.c.bf16 %v1075_v26, %v1075_v26  ;;  %v1092_v31 = vpack.c.bf16 %v1076_v38, %v1076_v38  ;;  %v1865_v37 = vunpack.c.h.bf16 %v2656_v33  ;;  %v1093_v63 = vpack.c.bf16 %v1077_v53, %v1077_v53  ;;  %1701 = vmatpush.msrb.mxu1 %v1602_v62  ;;  %v2691_v49 = vld [vmem:[#allocation13 + $0x20] sm:$0xff]  }
 0x43e   :  { %v1094_v14 = vpack.c.bf16 %v1078_v55, %v1078_v55  ;;  %v1095_v0 = vpack.c.bf16 %v1079_v10, %v1079_v10  ;;  %v1096_v1 = vpack.c.bf16 %v1080_v2, %v1080_v2  ;;  %v1097_v4 = vpack.c.bf16 %v1081_v6, %v1081_v6  ;;  %v1933_v55 = vld [vmem:[#allocation13 + $0x28] sm:$0xff]   ;;  %1723 = vmatpush.msra.mxu3 %v1616_v44 }
 0x43f   :  { %v2661_v39 = vunpack.c.l.bf16 %v1082_v5  ;;  %v2663_v12 = vunpack.c.l.bf16 %v1083_v57  ;;  %v2665_v30 = vunpack.c.l.bf16 %v1084_v58  ;;  %v2667_v17 = vunpack.c.l.bf16 %v1085_v9  ;;  %1702 = vmatpush.msrb.mxu1 %v1601_v13 }
 0x440   :  { %v2669_v21 = vunpack.c.l.bf16 %v1086_v28  ;;  %v2671_v19 = vunpack.c.l.bf16 %v1087_v29  ;;  %v2673_v22 = vunpack.c.l.bf16 %v1088_v61  ;;  %v2675_v32 = vunpack.c.l.bf16 %v1089_v46  ;;  %v1935_v61 = vld [vmem:[#allocation13 + $0x38] sm:$0xff]  }
 0x441   :  { %v2677_v60 = vunpack.c.l.bf16 %v1090_v51  ;;  %v2679_v36 = vunpack.c.l.bf16 %v1091_v3  ;;  %v2681_v24 = vunpack.c.l.bf16 %v1092_v31  ;;  %v2683_v45 = vunpack.c.l.bf16 %v1093_v63  ;;  %1703 = vmatpush.msrb.mxu1 %v1600_v43 }
 0x442   :  { %v2685_v47 = vunpack.c.l.bf16 %v1094_v14  ;;  %v2687_v56 = vunpack.c.l.bf16 %v1095_v0  ;;  %v2689_v48 = vunpack.c.l.bf16 %v1096_v1  ;;  %v2693_v59 = vunpack.c.l.bf16 %v1097_v4 }
 0x443   :  { %v1130_v50 = vmul.f32 %v1852_v8, %v2661_v39  ;;  %v1131_v34 = vmul.f32 %v1853_v25, %v2663_v12  ;;  %v1132_v26 = vmul.f32 %v1856_v40, %v2665_v30  ;;  %v1133_v38 = vmul.f32 %v1857_v42, %v2667_v17 }
 0x444   :  { %v1134_v53 = vmul.f32 %v1860_v35, %v2669_v21  ;;  %v1135_v41 = vmul.f32 %v1861_v7, %v2671_v19  ;;  %v1136_v54 = vmul.f32 %v1864_v20, %v2673_v22  ;;  %v1137_v10 = vmul.f32 %v1865_v37, %v2675_v32 }
 0x445   :  { %v1138_v2 = vmul.f32 %v1852_v8, %v2677_v60  ;;  %v1139_v5 = vmul.f32 %v1853_v25, %v2679_v36  ;;  %v1868_v6 = vunpack.c.l.bf16 %v2691_v49  ;;  %v1140_v57 = vmul.f32 %v1856_v40, %v2681_v24 }
 0x446   :  { %v1141_v58 = vmul.f32 %v1857_v42, %v2683_v45  ;;  %v1142_v9 = vmul.f32 %v1860_v35, %v2685_v47  ;;  %v1143_v8 = vmul.f32 %v1861_v7, %v2687_v56  ;;  %v1144_v15 = vmul.f32 %v1864_v20, %v2689_v48 }
 0x447   :  { %v1146_v25 = vpack.c.bf16 %v1131_v34, %v1130_v50  ;;  %v1869_v11 = vunpack.c.h.bf16 %v2691_v49  ;;  %v1872_v40 = vunpack.c.l.bf16 %v1933_v55  ;;  %v1145_v18 = vmul.f32 %v1865_v37, %v2693_v59 }
 0x448   :  { %v1147_v42 = vpack.c.bf16 %v1133_v38, %v1132_v26  ;;  %v1148_v28 = vpack.c.bf16 %v1135_v41, %v1134_v53  ;;  %v1150_v29 = vpack.c.bf16 %v1139_v5, %v1138_v2  ;;  %v1151_v35 = vpack.c.bf16 %v1141_v58, %v1140_v57 }
 0x449   :  { %v1154_v46 = vunpack.c.l.bf16 %v1146_v25  ;;  %v1155_v51 = vunpack.c.h.bf16 %v1146_v25  ;;  %v1873_v23 = vunpack.c.h.bf16 %v1933_v55  ;;  %v1149_v7 = vpack.c.bf16 %v1137_v10, %v1136_v54 }
 0x44a   :  { %v1152_v3 = vpack.c.bf16 %v1143_v8, %v1142_v9  ;;  %v1876_v31 = vunpack.c.l.bf16 %v1934_v27  ;;  %v1877_v33 = vunpack.c.h.bf16 %v1934_v27  ;;  %v1162_v20 = vunpack.c.l.bf16 %v1150_v29 }
 0x44b   :  { %v1163_v62 = vunpack.c.h.bf16 %v1150_v29  ;;  %v1880_v52 = vunpack.c.l.bf16 %v1935_v61  ;;  %v1881_v63 = vunpack.c.h.bf16 %v1935_v61  ;;  %v1153_v14 = vpack.c.bf16 %v1145_v18, %v1144_v15 }
 0x44c   :  { %v1156_v0 = vunpack.c.l.bf16 %v1147_v42  ;;  %v1157_v1 = vunpack.c.h.bf16 %v1147_v42  ;;  %v1158_v37 = vunpack.c.l.bf16 %v1148_v28  ;;  %v1159_v4 = vunpack.c.h.bf16 %v1148_v28 }
 0x44d   :  { %v1164_v13 = vunpack.c.l.bf16 %v1151_v35  ;;  %v1170_v16 = vadd.f32 %v1155_v51, %v1154_v46  ;;  %v1183_v43 = vadd.f32 %v1163_v62, %v1162_v20  ;;  %v1160_v44 = vunpack.c.l.bf16 %v1149_v7 }
 0x44e   :  { %v1161_v49 = vunpack.c.h.bf16 %v1149_v7  ;;  %v1165_v50 = vunpack.c.h.bf16 %v1151_v35  ;;  %v1166_v34 = vunpack.c.l.bf16 %v1152_v3  ;;  %v1213_v53 = vmul.f32 %v1868_v6, %v2661_v39 }
 0x44f   :  { %v1171_v26 = vadd.f32 %v1170_v16, %v1156_v0  ;;  %v1184_v38 = vadd.f32 %v1183_v43, %v1164_v13  ;;  %v1214_v41 = vmul.f32 %v1869_v11, %v2663_v12  ;;  %v1167_v54 = vunpack.c.h.bf16 %v1152_v3 }
 0x450   :  { %v1168_v55 = vunpack.c.l.bf16 %v1153_v14  ;;  %v1221_v10 = vmul.f32 %v1868_v6, %v2677_v60  ;;  %v1222_v2 = vmul.f32 %v1869_v11, %v2679_v36  ;;  %v1215_v58 = vmul.f32 %v1872_v40, %v2665_v30 }
 0x451   :  { %v1172_v5 = vadd.f32 %v1171_v26, %v1157_v1  ;;  %v1185_v57 = vadd.f32 %v1184_v38, %v1165_v50  ;;  %v1216_v9 = vmul.f32 %v1873_v23, %v2667_v17  ;;  %v1217_v8 = vmul.f32 %v1876_v31, %v2669_v21 }
 0x452   :  { %v1218_v15 = vmul.f32 %v1877_v33, %v2671_v19  ;;  %v1223_v25 = vmul.f32 %v1872_v40, %v2681_v24  ;;  %v1224_v27 = vmul.f32 %v1873_v23, %v2683_v45  ;;  %v1219_v6 = vmul.f32 %v1880_v52, %v2673_v22 }
 0x453   :  { %v1173_v18 = vadd.f32 %v1172_v5, %v1158_v37  ;;  %v1186_v42 = vadd.f32 %v1185_v57, %v1166_v34  ;;  %v1229_v28 = vpack.c.bf16 %v1214_v41, %v1213_v53  ;;  %v1220_v11 = vmul.f32 %v1881_v63, %v2675_v32 }
 0x454   :  { %v1225_v29 = vmul.f32 %v1876_v31, %v2685_v47  ;;  %v1226_v61 = vmul.f32 %v1877_v33, %v2687_v56  ;;  %v1233_v35 = vpack.c.bf16 %v1222_v2, %v1221_v10  ;;  %v1227_v7 = vmul.f32 %v1880_v52, %v2689_v48 }
 0x455   :  { %v1174_v46 = vadd.f32 %v1173_v18, %v1159_v4  ;;  %v1187_v51 = vadd.f32 %v1186_v42, %v1167_v54  ;;  %v1228_v40 = vmul.f32 %v1881_v63, %v2693_v59  ;;  %v1169_v3 = vunpack.c.h.bf16 %v1153_v14 }
 0x456   :  { %v1230_v23 = vpack.c.bf16 %v1216_v9, %v1215_v58  ;;  %v1231_v20 = vpack.c.bf16 %v1218_v15, %v1217_v8  ;;  %v1234_v62 = vpack.c.bf16 %v1224_v27, %v1223_v25  ;;  %v1237_v37 = vunpack.c.l.bf16 %v1229_v28  ;;  %v1936_v8 = vld [vmem:[#allocation13 + $0x48] sm:$0xff]  }
 0x457   :  { %v1175_v0 = vadd.f32 %v1174_v46, %v1160_v44  ;;  %v1188_v1 = vadd.f32 %v1187_v51, %v1168_v55  ;;  %v1238_v13 = vunpack.c.h.bf16 %v1229_v28  ;;  %v2757_v16 = vpack.c.bf16 %v1220_v11, %v1219_v6  ;;  %v1883_v44 = vld [vmem:[#allocation13 + $0x40] sm:$0xff]  }
 0x458   :  { %v1245_v31 = vunpack.c.l.bf16 %v1233_v35  ;;  %v1246_v43 = vunpack.c.h.bf16 %v1233_v35  ;;  %v1235_v4 = vpack.c.bf16 %v1226_v61, %v1225_v29  ;;  %v1236_v34 = vpack.c.bf16 %v1228_v40, %v1227_v7  ;;  %v1937_v29 = vld [vmem:[#allocation13 + $0x50] sm:$0xff]  }
 0x459   :  { %v1176_v33 = vadd.f32 %v1175_v0, %v1161_v49  ;;  %v1189_v50 = vadd.f32 %v1188_v1, %v1169_v3  ;;  %v1239_v26 = vunpack.c.l.bf16 %v1230_v23  ;;  %v1240_v52 = vunpack.c.h.bf16 %v1230_v23 }
 0x45a   :  { %v1241_v38 = vunpack.c.l.bf16 %v1231_v20  ;;  %v1247_v63 = vunpack.c.l.bf16 %v1234_v62  ;;  %v1253_v41 = vadd.f32 %v1238_v13, %v1237_v37  ;;  %v1266_v54 = vadd.f32 %v1246_v43, %v1245_v31 }
 0x45b   :  { %v1177_v14 = vrot.slane %v1176_v33, 4  ;;  %v1190_v53 = vrot.slane %v1189_v50, 4  ;;  %v1242_v55 = vunpack.c.h.bf16 %v1231_v20  ;;  %v1243_v10 = vunpack.c.l.bf16 %v2757_v16  ;;  %v1938_v20 = vld [vmem:[#allocation13 + $0x58] sm:$0xff]  }
 0x45c   :  { %v1244_v2 = vunpack.c.h.bf16 %v2757_v16  ;;  %v1248_v5 = vunpack.c.h.bf16 %v1234_v62  ;;  %v1254_v58 = vadd.f32 %v1253_v41, %v1239_v26  ;;  %v1267_v9 = vadd.f32 %v1266_v54, %v1247_v63 }
 0x45d   :  { %v1178_v57 = vadd.f32 %v1177_v14, %v1176_v33  ;;  %v1191_v49 = vadd.f32 %v1190_v53, %v1189_v50  ;;  %v1249_v15 = vunpack.c.l.bf16 %v1235_v4  ;;  %v1250_v25 = vunpack.c.h.bf16 %v1235_v4 }
 0x45e   :  { %v1884_v27 = vunpack.c.l.bf16 %v1883_v44  ;;  %v1885_v18 = vunpack.c.h.bf16 %v1883_v44  ;;  %v1255_v28 = vadd.f32 %v1254_v58, %v1240_v52  ;;  %v1268_v11 = vadd.f32 %v1267_v9, %v1248_v5 }
 0x45f   :  { %v1179_v42 = vrot.slane %v1178_v57, 2  ;;  %v1192_v6 = vrot.slane %v1191_v49, 2  ;;  %v1251_v61 = vunpack.c.l.bf16 %v1236_v34  ;;  %v1252_v35 = vunpack.c.h.bf16 %v1236_v34 }
 0x460   :  { %v1888_v46 = vunpack.c.l.bf16 %v1936_v8  ;;  %v1889_v51 = vunpack.c.h.bf16 %v1936_v8  ;;  %v1256_v3 = vadd.f32 %v1255_v28, %v1241_v38  ;;  %v1269_v23 = vadd.f32 %v1268_v11, %v1249_v15 }
 0x461   :  { %v1180_v7 = vadd.f32 %v1179_v42, %v1178_v57  ;;  %v1193_v40 = vadd.f32 %v1192_v6, %v1191_v49  ;;  %v1892_v62 = vunpack.c.l.bf16 %v1937_v29  ;;  %v1893_v0 = vunpack.c.h.bf16 %v1937_v29 }
 0x462   :  { %v1296_v1 = vmul.f32 %v1884_v27, %v2661_v39  ;;  %v1297_v37 = vmul.f32 %v1885_v18, %v2663_v12  ;;  %v1257_v31 = vadd.f32 %v1256_v3, %v1242_v55  ;;  %v1270_v43 = vadd.f32 %v1269_v23, %v1250_v25  ;;  %v1614_v23 = vld [vmem:[#allocation14 + $0x210] sm:$0xff] }
 0x463   :  { %v1181_v13 = vrot.slane %v1180_v7, 1  ;;  %v1194_v16 = vrot.slane %v1193_v40, 1  ;;  %v1896_v33 = vunpack.c.l.bf16 %v1938_v20  ;;  %v1897_v50 = vunpack.c.h.bf16 %v1938_v20 }
 0x464   :  { %v1304_v4 = vmul.f32 %v1884_v27, %v2677_v60  ;;  %v1305_v34 = vmul.f32 %v1885_v18, %v2679_v36  ;;  %v1258_v38 = vadd.f32 %v1257_v31, %v1243_v10  ;;  %v1271_v63 = vadd.f32 %v1270_v43, %v1251_v61 }
 0x465   :  { %v1182_v26 = vadd.f32 %v1181_v13, %v1180_v7  ;;  %v1195_v52 = vadd.f32 %v1194_v16, %v1193_v40  ;;  %v1298_v14 = vmul.f32 %v1888_v46, %v2665_v30  ;;  %v1299_v53 = vmul.f32 %v1889_v51, %v2667_v17  ;;  %v1899_v13 = vld [vmem:[#allocation13 + $0x60] sm:$0xff]  }
 0x466   :  { %v1300_v41 = vmul.f32 %v1892_v62, %v2669_v21  ;;  %v1301_v54 = vmul.f32 %v1893_v0, %v2671_v19  ;;  %v1259_v55 = vadd.f32 %v1258_v38, %v1244_v2  ;;  %v1272_v5 = vadd.f32 %v1271_v63, %v1252_v35  ;;  %v1599_v35 = vld [vmem:[#allocation14 + $0x198] sm:$0xff]  ;;  %v1612_v38 = vld [vmem:[#allocation14 + $0x200] sm:$0xff] }
 0x467   :  { %v1530_v44 = vsel %vm568_vm1, %v1195_v52, %v1182_v26  ;;  %v1312_v57 = vpack.c.bf16 %v1297_v37, %v1296_v1  ;;  %v1302_v49 = vmul.f32 %v1896_v33, %v2673_v22  ;;  %v1306_v58 = vmul.f32 %v1888_v46, %v2681_v24  ;;  %v1615_v46 = vld [vmem:[#allocation14 + $0x218] sm:$0xff]  ;;  %1704 = vmatpush.msrb.mxu1 %v1599_v35  ;;  %v1597_v1 = vld [vmem:[#allocation14 + $0x188] sm:$0xff]  ;;  %v1596_v52 = vld [vmem:[#allocation14 + $0x180] sm:$0xff] }
 0x468   :  { %1648 = vmatmul.f32.vlgmr.msra.gmra.mxu1 %v1530_v44  ;;  %v1307_v10 = vmul.f32 %v1889_v51, %v2683_v45  ;;  %v1316_v9 = vpack.c.bf16 %v1305_v34, %v1304_v4  ;;  %v1260_v8 = vrot.slane %v1259_v55, 4  ;;  %v1273_v15 = vrot.slane %v1272_v5, 4  ;;  %v1598_v51 = vld [vmem:[#allocation14 + $0x190] sm:$0xff]  ;;  %1724 = vmatpush.msra.mxu3 %v1615_v46  ;;  %v1613_v37 = vld [vmem:[#allocation14 + $0x208] sm:$0xff] }
 0x469   :  { %v1303_v25 = vmul.f32 %v1897_v50, %v2675_v32  ;;  %v1308_v27 = vmul.f32 %v1892_v62, %v2685_v47  ;;  %v1309_v18 = vmul.f32 %v1893_v0, %v2687_v56  ;;  %v1310_v2 = vmul.f32 %v1896_v33, %v2689_v48  ;;  %1705 = vmatpush.msrb.mxu1 %v1598_v51 }
 0x46a   :  { %v1311_v42 = vmul.f32 %v1897_v50, %v2693_v59  ;;  %v1313_v6 = vpack.c.bf16 %v1299_v53, %v1298_v14  ;;  %v1261_v28 = vadd.f32 %v1260_v8, %v1259_v55  ;;  %v1274_v11 = vadd.f32 %v1273_v15, %v1272_v5  ;;  %1725 = vmatpush.msra.mxu3 %v1614_v23 }
 0x46b   :  { %v1320_v29 = vunpack.c.l.bf16 %v1312_v57  ;;  %v1321_v61 = vunpack.c.h.bf16 %v1312_v57  ;;  %v1314_v7 = vpack.c.bf16 %v1301_v54, %v1300_v41  ;;  %v1317_v40 = vpack.c.bf16 %v1307_v10, %v1306_v58  ;;  %1706 = vmatpush.msrb.mxu1 %v1597_v1  ;;  %v1939_v57 = vld [vmem:[#allocation13 + $0x68] sm:$0xff]  }
 0x46c   :  { %v1328_v3 = vunpack.c.l.bf16 %v1316_v9  ;;  %v1262_v20 = vrot.slane %v1261_v28, 2  ;;  %v1275_v62 = vrot.slane %v1274_v11, 2  ;;  %v1329_v0 = vunpack.c.h.bf16 %v1316_v9  ;;  %1726 = vmatpush.msra.mxu3 %v1613_v37 }
 0x46d   :  { %v2778_v16 = vpack.c.bf16 %v1303_v25, %v1302_v49  ;;  %v1318_v31 = vpack.c.bf16 %v1309_v18, %v1308_v27  ;;  %v2780_v43 = vpack.c.bf16 %v1311_v42, %v1310_v2  ;;  %v1322_v33 = vunpack.c.l.bf16 %v1313_v6  ;;  %1707 = vmatpush.msrb.mxu1 %v1596_v52  ;;  %v1940_v18 = vld [vmem:[#allocation13 + $0x70] sm:$0xff]  }
 0x46e   :  { %v1263_v50 = vadd.f32 %v1262_v20, %v1261_v28  ;;  %v1276_v4 = vadd.f32 %v1275_v62, %v1274_v11  ;;  %v1323_v34 = vunpack.c.h.bf16 %v1313_v6  ;;  %v1336_v26 = vadd.f32 %v1321_v61, %v1320_v29  ;;  %1727 = vmatpush.msra.mxu3 %v1612_v38  ;;  %v1941_v11 = vld [vmem:[#allocation13 + $0x78] sm:$0xff]  }
 0x46f   :  { %v1324_v63 = vunpack.c.l.bf16 %v1314_v7  ;;  %v1330_v14 = vunpack.c.l.bf16 %v1317_v40  ;;  %v1349_v53 = vadd.f32 %v1329_v0, %v1328_v3  ;;  %v1900_v41 = vunpack.c.l.bf16 %v1899_v13 }
 0x470   :  { %v1264_v54 = vrot.slane %v1263_v50, 1  ;;  %v1277_v44 = vrot.slane %v1276_v4, 1  ;;  %v1337_v55 = vadd.f32 %v1336_v26, %v1322_v33  ;;  %v1901_v5 = vunpack.c.h.bf16 %v1899_v13 }
 0x471   :  { %v1325_v49 = vunpack.c.h.bf16 %v1314_v7  ;;  %v1326_v58 = vunpack.c.l.bf16 %v2778_v16  ;;  %v1331_v10 = vunpack.c.h.bf16 %v1317_v40  ;;  %v1350_v9 = vadd.f32 %v1349_v53, %v1330_v14 }
 0x472   :  { %v1265_v8 = vadd.f32 %v1264_v54, %v1263_v50  ;;  %v1278_v15 = vadd.f32 %v1277_v44, %v1276_v4  ;;  %v1327_v25 = vunpack.c.h.bf16 %v2778_v16  ;;  %v1338_v27 = vadd.f32 %v1337_v55, %v1323_v34 }
 0x473   :  { %v1332_v2 = vunpack.c.l.bf16 %v1318_v31  ;;  %v1351_v42 = vadd.f32 %v1350_v9, %v1331_v10  ;;  %v1904_v6 = vunpack.c.l.bf16 %v1939_v57  ;;  %v1905_v28 = vunpack.c.h.bf16 %v1939_v57 }
 0x474   :  { %v1534_v29 = vsel %vm568_vm1, %v1278_v15, %v1265_v8  ;;  %v1339_v61 = vadd.f32 %v1338_v27, %v1324_v63  ;;  %v1379_v35 = vmul.f32 %v1900_v41, %v2661_v39  ;;  %v1380_v46 = vmul.f32 %v1901_v5, %v2663_v12 }
 0x475   :  { %1668 = vmatmul.f32.vlgmr.msrb.gmra.mxu3 %v1534_v29  ;;  %v1333_v51 = vunpack.c.h.bf16 %v1318_v31  ;;  %v1352_v7 = vadd.f32 %v1351_v42, %v1332_v2  ;;  %v1908_v40 = vunpack.c.l.bf16 %v1940_v18  ;;  %v1909_v3 = vunpack.c.h.bf16 %v1940_v18 }
 0x476   :  { %v1340_v23 = vadd.f32 %v1339_v61, %v1325_v49  ;;  %v1912_v20 = vunpack.c.l.bf16 %v1941_v11  ;;  %v1387_v62 = vmul.f32 %v1900_v41, %v2677_v60  ;;  %v1388_v0 = vmul.f32 %v1901_v5, %v2679_v36 }
 0x477   :  { %v1334_v1 = vunpack.c.l.bf16 %v2780_v43  ;;  %v1335_v37 = vunpack.c.h.bf16 %v2780_v43  ;;  %v1353_v13 = vadd.f32 %v1352_v7, %v1333_v51  ;;  %v1913_v16 = vunpack.c.h.bf16 %v1941_v11 }
 0x478   :  { %v1341_v33 = vadd.f32 %v1340_v23, %v1326_v58  ;;  %v1381_v50 = vmul.f32 %v1904_v6, %v2665_v30  ;;  %v1382_v31 = vmul.f32 %v1905_v28, %v2667_v17  ;;  %v1395_v4 = vpack.c.bf16 %v1380_v46, %v1379_v35 }
 0x479   :  { %v1354_v34 = vadd.f32 %v1353_v13, %v1334_v1  ;;  %v1383_v26 = vmul.f32 %v1908_v40, %v2669_v21  ;;  %v1389_v52 = vmul.f32 %v1904_v6, %v2681_v24  ;;  %v1390_v38 = vmul.f32 %v1905_v28, %v2683_v45  ;;  %v1915_v28 = vld [vmem:[#allocation13 + $0x80] sm:$0xff]  }
 0x47a   :  { %v1342_v63 = vadd.f32 %v1341_v33, %v1327_v25  ;;  %v1384_v14 = vmul.f32 %v1909_v3, %v2671_v19  ;;  %v1385_v43 = vmul.f32 %v1912_v20, %v2673_v22  ;;  %v1399_v53 = vpack.c.bf16 %v1388_v0, %v1387_v62 }
 0x47b   :  { %v1355_v41 = vadd.f32 %v1354_v34, %v1335_v37  ;;  %v1386_v54 = vmul.f32 %v1913_v16, %v2675_v32  ;;  %v1391_v44 = vmul.f32 %v1908_v40, %v2685_v47  ;;  %v1392_v55 = vmul.f32 %v1909_v3, %v2687_v56 }
 0x47c   :  { %v1343_v5 = vrot.slane %v1342_v63, 4  ;;  %v1396_v57 = vpack.c.bf16 %v1382_v31, %v1381_v50  ;;  %v1403_v49 = vunpack.c.l.bf16 %v1395_v4  ;;  %v1404_v58 = vunpack.c.h.bf16 %v1395_v4 }
 0x47d   :  { %v1356_v10 = vrot.slane %v1355_v41, 4  ;;  %v1393_v9 = vmul.f32 %v1912_v20, %v2689_v48  ;;  %v1394_v8 = vmul.f32 %v1913_v16, %v2693_v59  ;;  %v1400_v15 = vpack.c.bf16 %v1390_v38, %v1389_v52  ;;  %v1942_v16 = vld [vmem:[#allocation13 + $0x88] sm:$0xff]  }
 0x47e   :  { %v1344_v25 = vadd.f32 %v1343_v5, %v1342_v63  ;;  %v1411_v27 = vunpack.c.l.bf16 %v1399_v53  ;;  %v1412_v18 = vunpack.c.h.bf16 %v1399_v53  ;;  %v1397_v42 = vpack.c.bf16 %v1384_v14, %v1383_v26 }
 0x47f   :  { %v1357_v2 = vadd.f32 %v1356_v10, %v1355_v41  ;;  %v1398_v6 = vpack.c.bf16 %v1386_v54, %v1385_v43  ;;  %v1401_v29 = vpack.c.bf16 %v1392_v55, %v1391_v44  ;;  %v1405_v61 = vunpack.c.l.bf16 %v1396_v57  ;;  %v1943_v55 = vld [vmem:[#allocation13 + $0x90] sm:$0xff]  }
 0x480   :  { %v1345_v11 = vrot.slane %v1344_v25, 2  ;;  %v1419_v35 = vadd.f32 %v1404_v58, %v1403_v49  ;;  %v1402_v51 = vpack.c.bf16 %v1394_v8, %v1393_v9  ;;  %v1413_v7 = vunpack.c.l.bf16 %v1400_v15 }
 0x481   :  { %v1358_v46 = vrot.slane %v1357_v2, 2  ;;  %v1432_v40 = vadd.f32 %v1412_v18, %v1411_v27  ;;  %v1406_v23 = vunpack.c.h.bf16 %v1396_v57  ;;  %v1916_v62 = vunpack.c.l.bf16 %v1915_v28 }
 0x482   :  { %v1346_v3 = vadd.f32 %v1345_v11, %v1344_v25  ;;  %v1420_v20 = vadd.f32 %v1419_v35, %v1405_v61  ;;  %v1414_v1 = vunpack.c.h.bf16 %v1400_v15  ;;  %v1917_v13 = vunpack.c.h.bf16 %v1915_v28 }
 0x483   :  { %v1359_v0 = vadd.f32 %v1358_v46, %v1357_v2  ;;  %v1433_v37 = vadd.f32 %v1432_v40, %v1413_v7  ;;  %v1407_v50 = vunpack.c.l.bf16 %v1397_v42  ;;  %v1408_v31 = vunpack.c.h.bf16 %v1397_v42  ;;  %v1944_v42 = vld [vmem:[#allocation13 + $0x98] sm:$0xff]  }
 0x484   :  { %v1347_v33 = vrot.slane %v1346_v3, 1  ;;  %v1421_v4 = vadd.f32 %v1420_v20, %v1406_v23  ;;  %v1415_v26 = vunpack.c.l.bf16 %v1401_v29  ;;  %v1416_v52 = vunpack.c.h.bf16 %v1401_v29 }
 0x485   :  { %v1360_v34 = vrot.slane %v1359_v0, 1  ;;  %v1434_v38 = vadd.f32 %v1433_v37, %v1414_v1  ;;  %v1920_v14 = vunpack.c.l.bf16 %v1942_v16  ;;  %v1921_v43 = vunpack.c.h.bf16 %v1942_v16 }
 0x486   :  { %v1422_v63 = vadd.f32 %v1421_v4, %v1407_v50  ;;  %v1462_v53 = vmul.f32 %v1916_v62, %v2661_v39  ;;  %v1348_v41 = vadd.f32 %v1347_v33, %v1346_v3  ;;  %v1463_v5 = vmul.f32 %v1917_v13, %v2663_v12 }
 0x487   :  { %v1361_v54 = vadd.f32 %v1360_v34, %v1359_v0  ;;  %v1435_v44 = vadd.f32 %v1434_v38, %v1415_v26  ;;  %v1409_v57 = vunpack.c.l.bf16 %v1398_v6  ;;  %v1410_v49 = vunpack.c.h.bf16 %v1398_v6 }
 0x488   :  { %v1417_v58 = vunpack.c.l.bf16 %v1402_v51  ;;  %v1423_v10 = vadd.f32 %v1422_v63, %v1408_v31  ;;  %v1470_v15 = vmul.f32 %v1916_v62, %v2677_v60  ;;  %v1471_v25 = vmul.f32 %v1917_v13, %v2679_v36 }
 0x489   :  { %v1538_v9 = vsel %vm568_vm1, %v1361_v54, %v1348_v41  ;;  %v1436_v8 = vadd.f32 %v1435_v44, %v1416_v52  ;;  %v1418_v27 = vunpack.c.h.bf16 %v1402_v51  ;;  %v1924_v18 = vunpack.c.l.bf16 %v1943_v55 }
 0x48a   :  { %1688 = vmatmul.f32.vlgmr.msra.gmra.mxu2 %v1538_v9  ;;  %v1424_v39 = vadd.f32 %v1423_v10, %v1409_v57  ;;  %v1925_v2 = vunpack.c.h.bf16 %v1943_v55  ;;  %v1464_v12 = vmul.f32 %v1920_v14, %v2665_v30  ;;  %v1465_v6 = vmul.f32 %v1921_v43, %v2667_v17 }
 0x48b   :  { %v1437_v28 = vadd.f32 %v1436_v8, %v1417_v58  ;;  %v1478_v11 = vpack.c.bf16 %v1463_v5, %v1462_v53  ;;  %v1472_v61 = vmul.f32 %v1920_v14, %v2681_v24  ;;  %v1473_v35 = vmul.f32 %v1921_v43, %v2683_v45 }
 0x48c   :  { %v1425_v29 = vadd.f32 %v1424_v39, %v1410_v49  ;;  %v1928_v46 = vunpack.c.l.bf16 %v1944_v42  ;;  %v1482_v36 = vpack.c.bf16 %v1471_v25, %v1470_v15  ;;  %v1929_v51 = vunpack.c.h.bf16 %v1944_v42 }
 0x48d   :  { %v1438_v60 = vadd.f32 %v1437_v28, %v1418_v27  ;;  %v1466_v40 = vmul.f32 %v1924_v18, %v2669_v21  ;;  %v1467_v3 = vmul.f32 %v1925_v2, %v2671_v19  ;;  %v1479_v20 = vpack.c.bf16 %v1465_v6, %v1464_v12 }
 0x48e   :  { %v1426_v7 = vrot.slane %v1425_v29, 4  ;;  %v1486_v30 = vunpack.c.l.bf16 %v1478_v11  ;;  %v1487_v62 = vunpack.c.h.bf16 %v1478_v11  ;;  %v1474_v0 = vmul.f32 %v1924_v18, %v2685_v47 }
 0x48f   :  { %v1439_v23 = vrot.slane %v1438_v60, 4  ;;  %v1475_v24 = vmul.f32 %v1925_v2, %v2687_v56  ;;  %v1483_v1 = vpack.c.bf16 %v1473_v35, %v1472_v61  ;;  %v1468_v37 = vmul.f32 %v1928_v46, %v2673_v22 }
 0x490   :  { %v1427_v17 = vadd.f32 %v1426_v7, %v1425_v29  ;;  %v1494_v13 = vunpack.c.l.bf16 %v1482_v36  ;;  %v1495_v16 = vunpack.c.h.bf16 %v1482_v36  ;;  %v1469_v21 = vmul.f32 %v1929_v51, %v2675_v32 }
 0x491   :  { %v1440_v45 = vadd.f32 %v1439_v23, %v1438_v60  ;;  %v1476_v19 = vmul.f32 %v1928_v46, %v2689_v48  ;;  %v1477_v50 = vmul.f32 %v1929_v51, %v2693_v59  ;;  %v1480_v4 = vpack.c.bf16 %v1467_v3, %v1466_v40 }
 0x492   :  { %v1428_v33 = vrot.slane %v1427_v17, 2  ;;  %v1488_v34 = vunpack.c.l.bf16 %v1479_v20  ;;  %v1502_v26 = vadd.f32 %v1487_v62, %v1486_v30  ;;  %v1484_v52 = vpack.c.bf16 %v1475_v24, %v1474_v0  ;;  %v1974_v62 = vld [vmem:[%s2836_s8] ss:$0 sm:$0xff] }
 0x493   :  { %v1441_v31 = vrot.slane %v1440_v45, 2  ;;  %v1496_v56 = vunpack.c.l.bf16 %v1483_v1  ;;  %v1515_v38 = vadd.f32 %v1495_v16, %v1494_v13  ;;  %v1489_v14 = vunpack.c.h.bf16 %v1479_v20 }
 0x494   :  { %v1429_v47 = vadd.f32 %v1428_v33, %v1427_v17  ;;  %v1503_v22 = vadd.f32 %v1502_v26, %v1488_v34  ;;  %v1497_v53 = vunpack.c.h.bf16 %v1483_v1  ;;  %v1481_v32 = vpack.c.bf16 %v1469_v21, %v1468_v37 }
 0x495   :  { %v1442_v63 = vadd.f32 %v1441_v31, %v1440_v45  ;;  %v1516_v41 = vadd.f32 %v1515_v38, %v1496_v56  ;;  %v1490_v44 = vunpack.c.l.bf16 %v1480_v4  ;;  %v1485_v55 = vpack.c.bf16 %v1477_v50, %v1476_v19 }
 0x496   :  { %v1430_v43 = vrot.slane %v1429_v47, 1  ;;  %v1504_v48 = vadd.f32 %v1503_v22, %v1489_v14  ;;  %v1498_v59 = vunpack.c.l.bf16 %v1484_v52  ;;  %v1491_v58 = vunpack.c.h.bf16 %v1480_v4 }
 0x497   :  { %v1443_v54 = vrot.slane %v1442_v63, 1  ;;  %v1517_v5 = vadd.f32 %v1516_v41, %v1497_v53  ;;  %v1499_v9 = vunpack.c.h.bf16 %v1484_v52  ;;  %v1492_v25 = vunpack.c.l.bf16 %v1481_v32 }
 0x498   :  { %v1431_v57 = vadd.f32 %v1430_v43, %v1429_v47  ;;  %v1505_v10 = vadd.f32 %v1504_v48, %v1490_v44  ;;  %v1500_v39 = vunpack.c.l.bf16 %v1485_v55  ;;  %v1493_v2 = vunpack.c.h.bf16 %v1481_v32 }
 0x499   :  { %v1444_v49 = vadd.f32 %v1443_v54, %v1442_v63  ;;  %v1518_v8 = vadd.f32 %v1517_v5, %v1498_v59  ;;  %v1501_v28 = vunpack.c.h.bf16 %v1485_v55 }
 0x49a   :  { %v1506_v27 = vadd.f32 %v1505_v10, %v1491_v58 }
 0x49b   :  { %v1542_v15 = vsel %vm568_vm1, %v1444_v49, %v1431_v57  ;;  %v1519_v18 = vadd.f32 %v1518_v8, %v1499_v9 }
 0x49c   :  { %1708 = vmatmul.f32.vlgmr.msrb.gmra.mxu1 %v1542_v15  ;;  %v1507_v42 = vadd.f32 %v1506_v27, %v1492_v25 }
 0x49d   :  { %v1520_v12 = vadd.f32 %v1519_v18, %v1500_v39 }
 0x49e   :  { %v1508_v6 = vadd.f32 %v1507_v42, %v1493_v2 }
 0x49f   :  { %v1521_v11 = vadd.f32 %v1520_v12, %v1501_v28 }
 0x4a0   :  { %v1509_v29 = vrot.slane %v1508_v6, 4 }
 0x4a1   :  { %v1522_v61 = vrot.slane %v1521_v11, 4 }
 0x4a2   :  { %v1510_v35 = vadd.f32 %v1509_v29, %v1508_v6 }
 0x4a3   :  { %v1523_v60 = vadd.f32 %v1522_v61, %v1521_v11 }
 0x4a4   :  { %v1511_v46 = vrot.slane %v1510_v35, 2 }
 0x4a5   :  { %v1524_v36 = vrot.slane %v1523_v60, 2 }
 0x4a6   :  { %v1512_v7 = vadd.f32 %v1511_v46, %v1510_v35 }
 0x4a7   :  { %v1525_v51 = vadd.f32 %v1524_v36, %v1523_v60 }
 0x4a8   :  { %v1513_v40 = vrot.slane %v1512_v7, 1 }
 0x4a9   :  { %v1526_v3 = vrot.slane %v1525_v51, 1 }
 0x4aa   :  { %v1514_v23 = vadd.f32 %v1513_v40, %v1512_v7 }
 0x4ab   :  { %v1527_v20 = vadd.f32 %v1526_v3, %v1525_v51 }
 0x4ad   :  { %v1546_v30 = vsel %vm568_vm1, %v1527_v20, %v1514_v23 }
 0x4ae   :  { %1728 = vmatmul.f32.vlgmr.msra.gmra.mxu3 %v1546_v30 }
 0x4e5   :  { %v1649_v17 = vpop.f32.mrf.mxu1 }
 0x4e6   :  { %v1650_v24 = vadd.f32 %v1974_v62, %v1649_v17 }
 0x4f8   :  { %v1669_v0 = vpop.f32.mrf.mxu3 }
 0x4f9   :  { %v1670_v1 = vadd.f32 %v1669_v0, %v1650_v24 }
 0x50d   :  { %v1689_v45 = vpop.f32.mrf.mxu2 }
 0x50e   :  { %v1690_v37 = vadd.f32 %v1689_v45, %v1670_v1 }
 0x519   :  { %v1709_v13 = vpop.f32.mrf.mxu1 }
 0x51a   :  { %v1710_v16 = vadd.f32 %v1709_v13, %v1690_v37 }
 0x531   :  { %v1729_v33 = vpop.f32.mrf.mxu3 }
 0x532   :  { %v1730_v21 = vadd.f32 %v1729_v33, %v1710_v16 }
 0x534   :  { %1732 = vst [vmem:[#allocation16] sm:$0x3] %v1730_v21 }
 0x535   :  { %1743 = dma.vmem_to_hbm [thread:$0]  %s1739_s18, 32, %s1741_s30, [#allocation4]  }
 0x536   :  { %2205 = dma.done.wait [#allocation4], 32  }
 0x537   :  { %2206 = vsyncadd [#allocation4], 4294967264 }
 0x538   :  { %1748 = vsyncpa [#allocation3], 1 }
 0x539   :  { %1749 = vsyncpa [#allocation6], 1 }
 0x53a   :  { %1750 = vsyncpa [#allocation9], 1 }
 0x53b   :  { %1751 = vsyncpa [#allocation12], 1 }
 0x53c   :  { %1752 = vsyncpa [#allocation15], 1 }
 0x53d   :  { %1753 = vsyncpa [#allocation4], 1 }

</bundles_post_ra>
